<compile_context>
chip_gen: v7x
topology: tpu7x:2x2x1
jax: 0.10.0
libtpu: 0.0.40
codegen_flags: <defaults>
</compile_context>

<pallas_src>
import functools

import jax
import jax.numpy as jnp
from jax import lax
from jax.experimental import pallas as pl
from jax.experimental.pallas import tpu as pltpu

# ---- synthetic config (stand-in for `config.*` in the PyTorch source) ----
TYPE = "GRU"
NUM_LAYERS = 1
BIDIRECTIONAL = False
HIDDEN_DIM = 32
EMBED_DIM = 16
OUTPUT_DIM = 20          # vocab size
MAX_LENGTH = 6
START_TOKEN = 1          # dataset.start
DROPOUT_RATE = 0.0       # num_layers <= 1 -> 0 in the reference module (identity)


def decoder_kernel(keysv_ref, h0_ref, emb_ref, ua_ref, va_ref, w_h_ref,
                   wih_ref, bih_ref, bhh_ref, bout_ref,
                   logits_out_ref, attn_out_ref, hidden_out_ref,
                   *, B, S, H, E, V, T, start_token):
    F = E + H                                                    # padded feature width

    # ---------------- loop-invariant work (hoisted, done exactly once) -------
    iota_v = lax.broadcasted_iota(jnp.int32, (B, V), 1)
    t_iota_v = lax.broadcasted_iota(jnp.int32, (B, T, V), 1)
    t_iota_s = lax.broadcasted_iota(jnp.int32, (B, T, S), 1)

    keysv = keysv_ref[...]                                       # (B, S, E+H): [0 | keys]
    # keys @ Ua computed ONCE for the whole decode (ua_ref is zero-padded so
    # contracting over E+H == contracting the original keys over H).
    kproj = jnp.dot(keysv.reshape(B * S, F), ua_ref[...],
                    preferred_element_type=jnp.float32).reshape(B, S, H)
    va = va_ref[...]                                             # (1, H)
    emb = emb_ref[...]                                           # (V, E+H): [emb | 0]
    w_h = w_h_ref[...]                                           # (H, 4H+V) = [Wa|Whh|Wout]
    wih = wih_ref[...]                                           # (E+H, 3H)
    bih = bih_ref[...]                                           # (1, 3H)
    bhh = bhh_ref[...]                                           # (1, 3H)
    bout = bout_ref[...]                                         # (1, V)

    h = h0_ref[...]                                              # (B, H)
    onehot = (iota_v == start_token).astype(jnp.float32)         # (B, V) start token

    # VMEM-resident output accumulators, written back to HBM exactly once.
    logits_all = jnp.zeros((B, T, V), jnp.float32)
    attn_all = jnp.zeros((B, T, S), jnp.float32)

    # ------------- statically unrolled greedy decode (T = MAX_LENGTH) --------
    # NOTE(vregs): hoisted operands + two accumulators stay well under the 64
    # vreg budget at these shapes; if a bundle dump ever shows spills, re-read
    # the rarely-reused small operands (emb, biases, va) from VMEM per step.
    for t in range(T):
        # One fused MXU push for everything that consumes h:
        #   [attention query | GRU h-gates | previous step's logits].
        hproj = jnp.dot(h, w_h, preferred_element_type=jnp.float32)          # (B, 4H+V)
        q_proj = hproj[:, :H]                                                # (B, H)
        gh = hproj[:, H:4 * H] + bhh                                         # (B, 3H)

        if t == 0:
            pass                                                 # start-token one-hot
        else:
            # logits of step t-1 (h @ Wout slice of the same MXU pop)
            logits_prev = hproj[:, 4 * H:] + bout                            # (B, V)
            logits_all = jnp.where(t_iota_v == (t - 1),
                                   logits_prev[:, None, :], logits_all)
            # greedy next token (argmax, first index on ties) -> next one-hot
            maxv = jnp.max(logits_prev, axis=-1, keepdims=True)
            idx = jnp.min(jnp.where(logits_prev >= maxv, iota_v, V),
                          axis=-1, keepdims=True)
            onehot = (iota_v == idx).astype(jnp.float32)

        # embedding lookup (one-hot @ padded table) + ReLU; columns E..E+H-1
        # are zero so this already sits in the [embed | 0] slot of the GRU input.
        embed_wide = jnp.maximum(
            jnp.dot(onehot, emb, preferred_element_type=jnp.float32), 0.0)   # (B, E+H)

        # Bahdanau attention (kproj hoisted above)
        energy = jnp.tanh(q_proj[:, None, :] + kproj)                        # (B, S, H)
        score = jnp.sum(energy * va[None, :, :], axis=-1)                    # (B, S)
        score = score - jnp.max(score, axis=-1, keepdims=True)
        p = jnp.exp(score)
        inv = pl.reciprocal(jnp.sum(p, axis=-1, keepdims=True))              # exact recip
        attn = p * inv                                                       # (B, S)
        attn_all = jnp.where(t_iota_s == t, attn[:, None, :], attn_all)

        # context lands in lanes E..E+H-1 (keysv has zeros in lanes 0..E-1)
        ctx_wide = jnp.sum(attn[:, :, None] * keysv, axis=1)                 # (B, E+H)

        # GRU cell: input = concat([relu(embed), context]) via VPU add; one
        # fused gi matmul; gate order r|z|n (PyTorch layout).
        x = embed_wide + ctx_wide                                            # (B, E+H)
        gi = jnp.dot(x, wih, preferred_element_type=jnp.float32) + bih       # (B, 3H)
        r = jax.nn.sigmoid(gi[:, 0:H] + gh[:, 0:H])
        z = jax.nn.sigmoid(gi[:, H:2 * H] + gh[:, H:2 * H])
        n = jnp.tanh(gi[:, 2 * H:3 * H] + r * gh[:, 2 * H:3 * H])
        h = (1.0 - z) * n + z * h

        # output projection / dropout are folded into the next iteration's
        # hproj (dropout is identity: rate == 0).

    # logits of the last step: one small dot with the Wout slice of w_h.
    logits_last = jnp.dot(h, w_h[:, 4 * H:],
                          preferred_element_type=jnp.float32) + bout         # (B, V)
    logits_all = jnp.where(t_iota_v == (T - 1), logits_last[:, None, :], logits_all)

    # single writeback per output, already in the caller's layout
    logits_out_ref[...] = logits_all                              # (B, T, V)
    attn_out_ref[...] = attn_all                                  # (B, T, S)
    hidden_out_ref[...] = h                                       # (B, H)


def make_params(key):
    H, E, V = HIDDEN_DIM, EMBED_DIM, OUTPUT_DIM
    ks = jax.random.split(key, 10)
    s = 1.0 / float(H) ** 0.5

    def u(k, shape, scale):
        return jax.random.uniform(k, shape, jnp.float32, -scale, scale)

    # Linear weights in (in, out) layout (== PyTorch weight.T); GRU gate columns
    # ordered [r | z | n] like PyTorch's weight_ih_l0 / weight_hh_l0.
    return dict(
        emb=u(ks[0], (V, E), 0.1),
        wa=u(ks[1], (H, H), s),
        ua=u(ks[2], (H, H), s),
        va=u(ks[3], (1, H), s),
        wih=u(ks[4], (E + H, 3 * H), s),
        whh=u(ks[5], (H, 3 * H), s),
        bih=u(ks[6], (1, 3 * H), s),
        bhh=u(ks[7], (1, 3 * H), s),
        wout=u(ks[8], (H, V), s),
        bout=u(ks[9], (1, V), s),
    )


def attention_decoder_forward(encoder_outputs, encoder_hidden, params,
                              max_length=MAX_LENGTH):
    """Greedy decode (target_tensor=None path of AttentionDecoder.forward)."""
    B, S, H = encoder_outputs.shape
    V, E = params["emb"].shape
    f32 = jnp.float32
    h0 = encoder_hidden.reshape(B, H)   # (num_layers*dirs=1, B, H) -> (B, H)

    # Fused h-path MXU operand: [Wa | Whh | Wout] -> (H, 4H + V).
    w_h = jnp.concatenate([params["wa"], params["whh"], params["wout"]], axis=1)
    # Zero-padded embedding table / attention values / Ua so the kernel can
    # build the GRU input with a VPU add instead of an unaligned lane concat:
    #   relu(onehot @ emb_pad) + (attn @ keys_val) == concat([relu(embed), ctx])
    emb_pad = jnp.concatenate([params["emb"], jnp.zeros((V, H), f32)], axis=1)   # (V, E+H)
    keys_val = jnp.concatenate(
        [jnp.zeros((B, S, E), f32), encoder_outputs], axis=-1)                    # (B, S, E+H)
    ua_pad = jnp.concatenate([jnp.zeros((E, H), f32), params["ua"]], axis=0)      # (E+H, H)

    kernel = functools.partial(decoder_kernel, B=B, S=S, H=H, E=E, V=V,
                               T=max_length, start_token=START_TOKEN)

    vmem = functools.partial(pl.BlockSpec, memory_space=pltpu.MemorySpace.VMEM)

    # Single kernel invocation (no grid): ~tens of KB total, fully VMEM
    # resident, one DMA in per operand and one DMA out per result.
    logits, attn, h_final = pl.pallas_call(
        kernel,
        out_shape=(
            jax.ShapeDtypeStruct((B, max_length, V), f32),
            jax.ShapeDtypeStruct((B, max_length, S), f32),
            jax.ShapeDtypeStruct((B, H), f32),
        ),
        in_specs=[vmem() for _ in range(10)],
        out_specs=(vmem(), vmem(), vmem()),
    )(keys_val, h0, emb_pad, ua_pad, params["va"], w_h,
      params["wih"], params["bih"], params["bhh"], params["bout"])

    decoder_outputs = logits          # (B, MAX_LENGTH, V)  -- caller layout, no transpose
    attentions = attn                 # (B, MAX_LENGTH, S)
    decoder_hidden = h_final[None]    # (1, B, H)
    return decoder_outputs, decoder_hidden, attentions


def reference_forward(encoder_outputs, encoder_hidden, params, max_length=MAX_LENGTH):
    """Pure-JAX reference of the same forward (for correctness check)."""
    B, S, H = encoder_outputs.shape
    h = encoder_hidden.reshape(B, H)
    tok = jnp.full((B,), START_TOKEN, jnp.int32)
    outs, attns = [], []
    for _ in range(max_length):
        embed = jax.nn.relu(params["emb"][tok])
        qp = h @ params["wa"]
        kp = jnp.einsum("bsh,hk->bsk", encoder_outputs, params["ua"])
        energy = jnp.tanh(qp[:, None, :] + kp)
        score = jnp.einsum("bsh,h->bs", energy, params["va"][0])
        attn = jax.nn.softmax(score, axis=-1)
        context = jnp.einsum("bs,bsh->bh", attn, encoder_outputs)
        x = jnp.concatenate([embed, context], axis=-1)
        gi = x @ params["wih"] + params["bih"][0]
        gh = h @ params["whh"] + params["bhh"][0]
        r = jax.nn.sigmoid(gi[:, :H] + gh[:, :H])
        z = jax.nn.sigmoid(gi[:, H:2 * H] + gh[:, H:2 * H])
        n = jnp.tanh(gi[:, 2 * H:] + r * gh[:, 2 * H:])
        h = (1 - z) * n + z * h
        logits = h @ params["wout"] + params["bout"][0]
        outs.append(logits[:, None, :])
        attns.append(attn[:, None, :])
        tok = jnp.argmax(logits, axis=-1)
    return jnp.concatenate(outs, axis=1), h[None], jnp.concatenate(attns, axis=1)


if __name__ == "__main__":
    key = jax.random.PRNGKey(0)
    kp, ke, kh = jax.random.split(key, 3)
    params = make_params(kp)

    B, S, H = 2, 8, HIDDEN_DIM
    encoder_outputs = jax.random.normal(ke, (B, S, H), jnp.float32)
    encoder_hidden = jax.random.normal(
        kh, (NUM_LAYERS * (1 + BIDIRECTIONAL), B, H), jnp.float32)

    out, hid, att = attention_decoder_forward(encoder_outputs, encoder_hidden, params)
    jax.block_until_ready((out, hid, att))

    ref_out, ref_hid, ref_att = reference_forward(encoder_outputs, encoder_hidden, params)

    assert out.shape == (B, MAX_LENGTH, OUTPUT_DIM)
    assert att.shape == (B, MAX_LENGTH, S)
    assert hid.shape == (1, B, H)

    # Greedy-feedback-aware comparison (per the perf-review correctness note):
    # a step's outputs are only comparable to the reference if every *input*
    # token up to that step agreed; a near-tie argmax flip makes the tail
    # incomparable without being a bug.
    tok = jnp.argmax(out, axis=-1)                                   # (B, T)
    ref_tok = jnp.argmax(ref_out, axis=-1)
    step_agree = jnp.all(tok == ref_tok, axis=0)                     # (T,)
    prefix_agree = jnp.cumprod(step_agree.astype(jnp.int32)).astype(bool)
    comparable = jnp.concatenate([jnp.array([True]), prefix_agree[:-1]])  # (T,)
    assert bool(comparable[0])
    mv = comparable[None, :, None]
    assert jnp.allclose(jnp.where(mv, out, 0.0), jnp.where(mv, ref_out, 0.0),
                        atol=2e-3, rtol=2e-3)
    assert jnp.allclose(jnp.where(mv, att, 0.0), jnp.where(mv, ref_att, 0.0),
                        atol=2e-3, rtol=2e-3)
    if bool(prefix_agree[-1]):
        assert jnp.allclose(hid, ref_hid, atol=2e-3, rtol=2e-3)

    print("KERNEL_OK")
</pallas_src>

<mosaic_0001>
module attributes {stable_mosaic.version = 11 : i64} {
  func.func @decoder_kernel(%arg0: memref<2x8x48xf32, #tpu.memory_space<vmem>>, %arg1: memref<2x32xf32, #tpu.memory_space<vmem>>, %arg2: memref<20x48xf32, #tpu.memory_space<vmem>>, %arg3: memref<48x32xf32, #tpu.memory_space<vmem>>, %arg4: memref<1x32xf32, #tpu.memory_space<vmem>>, %arg5: memref<32x148xf32, #tpu.memory_space<vmem>>, %arg6: memref<48x96xf32, #tpu.memory_space<vmem>>, %arg7: memref<1x96xf32, #tpu.memory_space<vmem>>, %arg8: memref<1x96xf32, #tpu.memory_space<vmem>>, %arg9: memref<1x20xf32, #tpu.memory_space<vmem>>, %arg10: memref<2x6x20xf32, #tpu.memory_space<vmem>>, %arg11: memref<2x6x8xf32, #tpu.memory_space<vmem>>, %arg12: memref<2x32xf32, #tpu.memory_space<vmem>>) attributes {dimension_semantics = [], scalar_prefetch = 0 : i64, scratch_operands = 0 : i64, tpu.core_type = #tpu.core_type<tc>} {
    %0 = tpu.iota {dimensions = array<i32: 1>} : vector<2x20xi32>
    %1 = tpu.iota {dimensions = array<i32: 1>} : vector<2x6x20xi32>
    %2 = tpu.iota {dimensions = array<i32: 1>} : vector<2x6x8xi32>
    %c0 = arith.constant 0 : index
    %c0_0 = arith.constant 0 : index
    %c0_1 = arith.constant 0 : index
    %3 = vector.load %arg0[%c0, %c0_0, %c0_1] : memref<2x8x48xf32, #tpu.memory_space<vmem>>, vector<2x8x48xf32>
    %4 = vector.shape_cast %3 : vector<2x8x48xf32> to vector<16x48xf32>
    %c0_2 = arith.constant 0 : index
    %c0_3 = arith.constant 0 : index
    %5 = vector.load %arg3[%c0_2, %c0_3] : memref<48x32xf32, #tpu.memory_space<vmem>>, vector<48x32xf32>
    %cst = arith.constant dense<0.000000e+00> : vector<16x32xf32>
    %6 = tpu.matmul %4, %5, %cst {dimension_numbers = #tpu.dot_dimension_numbers<[1], [0], [0], [1], [0, 0, 1, 1], [], []>} : vector<16x48xf32>, vector<48x32xf32>, vector<16x32xf32> -> vector<16x32xf32>
    %7 = vector.shape_cast %6 : vector<16x32xf32> to vector<2x8x32xf32>
    %c0_4 = arith.constant 0 : index
    %c0_5 = arith.constant 0 : index
    %8 = vector.load %arg4[%c0_4, %c0_5] : memref<1x32xf32, #tpu.memory_space<vmem>>, vector<1x32xf32>
    %c0_6 = arith.constant 0 : index
    %c0_7 = arith.constant 0 : index
    %9 = vector.load %arg2[%c0_6, %c0_7] : memref<20x48xf32, #tpu.memory_space<vmem>>, vector<20x48xf32>
    %c0_8 = arith.constant 0 : index
    %c0_9 = arith.constant 0 : index
    %10 = vector.load %arg5[%c0_8, %c0_9] : memref<32x148xf32, #tpu.memory_space<vmem>>, vector<32x148xf32>
    %c0_10 = arith.constant 0 : index
    %c0_11 = arith.constant 0 : index
    %11 = vector.load %arg6[%c0_10, %c0_11] : memref<48x96xf32, #tpu.memory_space<vmem>>, vector<48x96xf32>
    %c0_12 = arith.constant 0 : index
    %c0_13 = arith.constant 0 : index
    %12 = vector.load %arg7[%c0_12, %c0_13] : memref<1x96xf32, #tpu.memory_space<vmem>>, vector<1x96xf32>
    %c0_14 = arith.constant 0 : index
    %c0_15 = arith.constant 0 : index
    %13 = vector.load %arg8[%c0_14, %c0_15] : memref<1x96xf32, #tpu.memory_space<vmem>>, vector<1x96xf32>
    %c0_16 = arith.constant 0 : index
    %c0_17 = arith.constant 0 : index
    %14 = vector.load %arg9[%c0_16, %c0_17] : memref<1x20xf32, #tpu.memory_space<vmem>>, vector<1x20xf32>
    %c0_18 = arith.constant 0 : index
    %c0_19 = arith.constant 0 : index
    %15 = vector.load %arg1[%c0_18, %c0_19] : memref<2x32xf32, #tpu.memory_space<vmem>>, vector<2x32xf32>
    %c1_i32 = arith.constant 1 : i32
    %16 = vector.broadcast %c1_i32 : i32 to vector<2x20xi32>
    %17 = arith.cmpi eq, %0, %16 : vector<2x20xi32>
    %18 = arith.extui %17 : vector<2x20xi1> to vector<2x20xi32>
    %19 = arith.sitofp %18 : vector<2x20xi32> to vector<2x20xf32>
    %cst_20 = arith.constant 0.000000e+00 : f32
    %20 = vector.broadcast %cst_20 : f32 to vector<2x6x20xf32>
    %cst_21 = arith.constant 0.000000e+00 : f32
    %21 = vector.broadcast %cst_21 : f32 to vector<2x6x8xf32>
    %cst_22 = arith.constant dense<0.000000e+00> : vector<2x148xf32>
    %22 = tpu.matmul %15, %10, %cst_22 {dimension_numbers = #tpu.dot_dimension_numbers<[1], [0], [0], [1], [0, 0, 1, 1], [], []>} : vector<2x32xf32>, vector<32x148xf32>, vector<2x148xf32> -> vector<2x148xf32>
    %23 = vector.extract_strided_slice %22 {offsets = [0, 0], sizes = [2, 32], strides = [1, 1]} : vector<2x148xf32> to vector<2x32xf32>
    %24 = vector.extract_strided_slice %22 {offsets = [0, 32], sizes = [2, 96], strides = [1, 1]} : vector<2x148xf32> to vector<2x96xf32>
    %25 = vector.broadcast %13 : vector<1x96xf32> to vector<2x96xf32>
    %26 = arith.addf %24, %25 : vector<2x96xf32>
    %cst_23 = arith.constant dense<0.000000e+00> : vector<2x48xf32>
    %27 = tpu.matmul %19, %9, %cst_23 {dimension_numbers = #tpu.dot_dimension_numbers<[1], [0], [0], [1], [0, 0, 1, 1], [], []>} : vector<2x20xf32>, vector<20x48xf32>, vector<2x48xf32> -> vector<2x48xf32>
    %cst_24 = arith.constant 0.000000e+00 : f32
    %28 = vector.broadcast %cst_24 : f32 to vector<2x48xf32>
    %29 = arith.maximumf %27, %28 : vector<2x48xf32>
    %30 = vector.shape_cast %23 : vector<2x32xf32> to vector<2x1x32xf32>
    %31 = vector.broadcast %30 : vector<2x1x32xf32> to vector<2x8x32xf32>
    %32 = arith.addf %31, %7 : vector<2x8x32xf32>
    %33 = math.tanh %32 : vector<2x8x32xf32>
    %34 = vector.shape_cast %8 : vector<1x32xf32> to vector<1x1x32xf32>
    %35 = vector.broadcast %34 : vector<1x1x32xf32> to vector<2x8x32xf32>
    %36 = arith.mulf %33, %35 : vector<2x8x32xf32>
    %cst_25 = arith.constant dense<0.000000e+00> : vector<2x8xf32>
    %37 = vector.multi_reduction <add>, %36, %cst_25 [2] : vector<2x8x32xf32> to vector<2x8xf32>
    %cst_26 = arith.constant dense<0xFF800000> : vector<2xf32>
    %38 = vector.multi_reduction <maximumf>, %37, %cst_26 [1] : vector<2x8xf32> to vector<2xf32>
    %39 = vector.shape_cast %38 : vector<2xf32> to vector<2x1xf32>
    %40 = vector.broadcast %39 : vector<2x1xf32> to vector<2x8xf32>
    %41 = arith.subf %37, %40 : vector<2x8xf32>
    %42 = math.exp %41 : vector<2x8xf32>
    %cst_27 = arith.constant dense<0.000000e+00> : vector<2xf32>
    %43 = vector.multi_reduction <add>, %42, %cst_27 [1] : vector<2x8xf32> to vector<2xf32>
    %44 = vector.shape_cast %43 : vector<2xf32> to vector<2x1xf32>
    %45 = tpu.reciprocal %44 : vector<2x1xf32> -> vector<2x1xf32>
    %46 = vector.broadcast %45 : vector<2x1xf32> to vector<2x8xf32>
    %47 = arith.mulf %42, %46 : vector<2x8xf32>
    %c0_i32 = arith.constant 0 : i32
    %48 = vector.broadcast %c0_i32 : i32 to vector<2x6x8xi32>
    %49 = arith.cmpi eq, %2, %48 : vector<2x6x8xi32>
    %50 = vector.shape_cast %47 : vector<2x8xf32> to vector<2x1x8xf32>
    %51 = vector.shape_cast %50 : vector<2x1x8xf32> to vector<2x1x8xf32>
    %52 = vector.broadcast %51 : vector<2x1x8xf32> to vector<2x6x8xf32>
    %53 = arith.select %49, %52, %21 : vector<2x6x8xi1>, vector<2x6x8xf32>
    %54 = vector.shape_cast %47 : vector<2x8xf32> to vector<2x8x1xf32>
    %55 = vector.broadcast %54 : vector<2x8x1xf32> to vector<2x8x48xf32>
    %56 = arith.mulf %55, %3 : vector<2x8x48xf32>
    %cst_28 = arith.constant dense<0.000000e+00> : vector<2x48xf32>
    %57 = vector.multi_reduction <add>, %56, %cst_28 [1] : vector<2x8x48xf32> to vector<2x48xf32>
    %58 = arith.addf %29, %57 : vector<2x48xf32>
    %cst_29 = arith.constant dense<0.000000e+00> : vector<2x96xf32>
    %59 = tpu.matmul %58, %11, %cst_29 {dimension_numbers = #tpu.dot_dimension_numbers<[1], [0], [0], [1], [0, 0, 1, 1], [], []>} : vector<2x48xf32>, vector<48x96xf32>, vector<2x96xf32> -> vector<2x96xf32>
    %60 = vector.broadcast %12 : vector<1x96xf32> to vector<2x96xf32>
    %61 = arith.addf %59, %60 : vector<2x96xf32>
    %62 = vector.extract_strided_slice %61 {offsets = [0, 0], sizes = [2, 32], strides = [1, 1]} : vector<2x96xf32> to vector<2x32xf32>
    %63 = vector.extract_strided_slice %26 {offsets = [0, 0], sizes = [2, 32], strides = [1, 1]} : vector<2x96xf32> to vector<2x32xf32>
    %64 = arith.addf %62, %63 : vector<2x32xf32>
    %65 = arith.negf %64 : vector<2x32xf32>
    %66 = math.exp %65 : vector<2x32xf32>
    %cst_30 = arith.constant 1.000000e+00 : f32
    %67 = vector.broadcast %cst_30 : f32 to vector<2x32xf32>
    %68 = arith.addf %67, %66 : vector<2x32xf32>
    %69 = arith.divf %67, %68 : vector<2x32xf32>
    %70 = vector.extract_strided_slice %61 {offsets = [0, 32], sizes = [2, 32], strides = [1, 1]} : vector<2x96xf32> to vector<2x32xf32>
    %71 = vector.extract_strided_slice %26 {offsets = [0, 32], sizes = [2, 32], strides = [1, 1]} : vector<2x96xf32> to vector<2x32xf32>
    %72 = arith.addf %70, %71 : vector<2x32xf32>
    %73 = arith.negf %72 : vector<2x32xf32>
    %74 = math.exp %73 : vector<2x32xf32>
    %cst_31 = arith.constant 1.000000e+00 : f32
    %75 = vector.broadcast %cst_31 : f32 to vector<2x32xf32>
    %76 = arith.addf %75, %74 : vector<2x32xf32>
    %77 = arith.divf %75, %76 : vector<2x32xf32>
    %78 = vector.extract_strided_slice %61 {offsets = [0, 64], sizes = [2, 32], strides = [1, 1]} : vector<2x96xf32> to vector<2x32xf32>
    %79 = vector.extract_strided_slice %26 {offsets = [0, 64], sizes = [2, 32], strides = [1, 1]} : vector<2x96xf32> to vector<2x32xf32>
    %80 = arith.mulf %69, %79 : vector<2x32xf32>
    %81 = arith.addf %78, %80 : vector<2x32xf32>
    %82 = math.tanh %81 : vector<2x32xf32>
    %cst_32 = arith.constant 1.000000e+00 : f32
    %83 = vector.broadcast %cst_32 : f32 to vector<2x32xf32>
    %84 = arith.subf %83, %77 : vector<2x32xf32>
    %85 = arith.mulf %84, %82 : vector<2x32xf32>
    %86 = arith.mulf %77, %15 : vector<2x32xf32>
    %87 = arith.addf %85, %86 : vector<2x32xf32>
    %cst_33 = arith.constant dense<0.000000e+00> : vector<2x148xf32>
    %88 = tpu.matmul %87, %10, %cst_33 {dimension_numbers = #tpu.dot_dimension_numbers<[1], [0], [0], [1], [0, 0, 1, 1], [], []>} : vector<2x32xf32>, vector<32x148xf32>, vector<2x148xf32> -> vector<2x148xf32>
    %89 = vector.extract_strided_slice %88 {offsets = [0, 0], sizes = [2, 32], strides = [1, 1]} : vector<2x148xf32> to vector<2x32xf32>
    %90 = vector.extract_strided_slice %88 {offsets = [0, 32], sizes = [2, 96], strides = [1, 1]} : vector<2x148xf32> to vector<2x96xf32>
    %91 = vector.broadcast %13 : vector<1x96xf32> to vector<2x96xf32>
    %92 = arith.addf %90, %91 : vector<2x96xf32>
    %93 = vector.extract_strided_slice %88 {offsets = [0, 128], sizes = [2, 20], strides = [1, 1]} : vector<2x148xf32> to vector<2x20xf32>
    %94 = vector.broadcast %14 : vector<1x20xf32> to vector<2x20xf32>
    %95 = arith.addf %93, %94 : vector<2x20xf32>
    %c0_i32_34 = arith.constant 0 : i32
    %96 = vector.broadcast %c0_i32_34 : i32 to vector<2x6x20xi32>
    %97 = arith.cmpi eq, %1, %96 : vector<2x6x20xi32>
    %98 = vector.shape_cast %95 : vector<2x20xf32> to vector<2x1x20xf32>
    %99 = vector.shape_cast %98 : vector<2x1x20xf32> to vector<2x1x20xf32>
    %100 = vector.broadcast %99 : vector<2x1x20xf32> to vector<2x6x20xf32>
    %101 = arith.select %97, %100, %20 : vector<2x6x20xi1>, vector<2x6x20xf32>
    %cst_35 = arith.constant dense<0xFF800000> : vector<2xf32>
    %102 = vector.multi_reduction <maximumf>, %95, %cst_35 [1] : vector<2x20xf32> to vector<2xf32>
    %103 = vector.shape_cast %102 : vector<2xf32> to vector<2x1xf32>
    %104 = vector.broadcast %103 : vector<2x1xf32> to vector<2x20xf32>
    %105 = arith.cmpf oge, %95, %104 : vector<2x20xf32>
    %c20_i32 = arith.constant 20 : i32
    %106 = vector.broadcast %c20_i32 : i32 to vector<2x20xi32>
    %107 = arith.select %105, %0, %106 : vector<2x20xi1>, vector<2x20xi32>
    %cst_36 = arith.constant dense<2147483647> : vector<2xi32>
    %108 = vector.multi_reduction <minsi>, %107, %cst_36 [1] : vector<2x20xi32> to vector<2xi32>
    %109 = vector.shape_cast %108 : vector<2xi32> to vector<2x1xi32>
    %110 = vector.broadcast %109 : vector<2x1xi32> to vector<2x20xi32>
    %111 = arith.cmpi eq, %0, %110 : vector<2x20xi32>
    %112 = arith.extui %111 : vector<2x20xi1> to vector<2x20xi32>
    %113 = arith.sitofp %112 : vector<2x20xi32> to vector<2x20xf32>
    %cst_37 = arith.constant dense<0.000000e+00> : vector<2x48xf32>
    %114 = tpu.matmul %113, %9, %cst_37 {dimension_numbers = #tpu.dot_dimension_numbers<[1], [0], [0], [1], [0, 0, 1, 1], [], []>} : vector<2x20xf32>, vector<20x48xf32>, vector<2x48xf32> -> vector<2x48xf32>
    %cst_38 = arith.constant 0.000000e+00 : f32
    %115 = vector.broadcast %cst_38 : f32 to vector<2x48xf32>
    %116 = arith.maximumf %114, %115 : vector<2x48xf32>
    %117 = vector.shape_cast %89 : vector<2x32xf32> to vector<2x1x32xf32>
    %118 = vector.broadcast %117 : vector<2x1x32xf32> to vector<2x8x32xf32>
    %119 = arith.addf %118, %7 : vector<2x8x32xf32>
    %120 = math.tanh %119 : vector<2x8x32xf32>
    %121 = vector.shape_cast %8 : vector<1x32xf32> to vector<1x1x32xf32>
    %122 = vector.broadcast %121 : vector<1x1x32xf32> to vector<2x8x32xf32>
    %123 = arith.mulf %120, %122 : vector<2x8x32xf32>
    %cst_39 = arith.constant dense<0.000000e+00> : vector<2x8xf32>
    %124 = vector.multi_reduction <add>, %123, %cst_39 [2] : vector<2x8x32xf32> to vector<2x8xf32>
    %cst_40 = arith.constant dense<0xFF800000> : vector<2xf32>
    %125 = vector.multi_reduction <maximumf>, %124, %cst_40 [1] : vector<2x8xf32> to vector<2xf32>
    %126 = vector.shape_cast %125 : vector<2xf32> to vector<2x1xf32>
    %127 = vector.broadcast %126 : vector<2x1xf32> to vector<2x8xf32>
    %128 = arith.subf %124, %127 : vector<2x8xf32>
    %129 = math.exp %128 : vector<2x8xf32>
    %cst_41 = arith.constant dense<0.000000e+00> : vector<2xf32>
    %130 = vector.multi_reduction <add>, %129, %cst_41 [1] : vector<2x8xf32> to vector<2xf32>
    %131 = vector.shape_cast %130 : vector<2xf32> to vector<2x1xf32>
    %132 = tpu.reciprocal %131 : vector<2x1xf32> -> vector<2x1xf32>
    %133 = vector.broadcast %132 : vector<2x1xf32> to vector<2x8xf32>
    %134 = arith.mulf %129, %133 : vector<2x8xf32>
    %c1_i32_42 = arith.constant 1 : i32
    %135 = vector.broadcast %c1_i32_42 : i32 to vector<2x6x8xi32>
    %136 = arith.cmpi eq, %2, %135 : vector<2x6x8xi32>
    %137 = vector.shape_cast %134 : vector<2x8xf32> to vector<2x1x8xf32>
    %138 = vector.shape_cast %137 : vector<2x1x8xf32> to vector<2x1x8xf32>
    %139 = vector.broadcast %138 : vector<2x1x8xf32> to vector<2x6x8xf32>
    %140 = arith.select %136, %139, %53 : vector<2x6x8xi1>, vector<2x6x8xf32>
    %141 = vector.shape_cast %134 : vector<2x8xf32> to vector<2x8x1xf32>
    %142 = vector.broadcast %141 : vector<2x8x1xf32> to vector<2x8x48xf32>
    %143 = arith.mulf %142, %3 : vector<2x8x48xf32>
    %cst_43 = arith.constant dense<0.000000e+00> : vector<2x48xf32>
    %144 = vector.multi_reduction <add>, %143, %cst_43 [1] : vector<2x8x48xf32> to vector<2x48xf32>
    %145 = arith.addf %116, %144 : vector<2x48xf32>
    %cst_44 = arith.constant dense<0.000000e+00> : vector<2x96xf32>
    %146 = tpu.matmul %145, %11, %cst_44 {dimension_numbers = #tpu.dot_dimension_numbers<[1], [0], [0], [1], [0, 0, 1, 1], [], []>} : vector<2x48xf32>, vector<48x96xf32>, vector<2x96xf32> -> vector<2x96xf32>
    %147 = vector.broadcast %12 : vector<1x96xf32> to vector<2x96xf32>
    %148 = arith.addf %146, %147 : vector<2x96xf32>
    %149 = vector.extract_strided_slice %148 {offsets = [0, 0], sizes = [2, 32], strides = [1, 1]} : vector<2x96xf32> to vector<2x32xf32>
    %150 = vector.extract_strided_slice %92 {offsets = [0, 0], sizes = [2, 32], strides = [1, 1]} : vector<2x96xf32> to vector<2x32xf32>
    %151 = arith.addf %149, %150 : vector<2x32xf32>
    %152 = arith.negf %151 : vector<2x32xf32>
    %153 = math.exp %152 : vector<2x32xf32>
    %cst_45 = arith.constant 1.000000e+00 : f32
    %154 = vector.broadcast %cst_45 : f32 to vector<2x32xf32>
    %155 = arith.addf %154, %153 : vector<2x32xf32>
    %156 = arith.divf %154, %155 : vector<2x32xf32>
    %157 = vector.extract_strided_slice %148 {offsets = [0, 32], sizes = [2, 32], strides = [1, 1]} : vector<2x96xf32> to vector<2x32xf32>
    %158 = vector.extract_strided_slice %92 {offsets = [0, 32], sizes = [2, 32], strides = [1, 1]} : vector<2x96xf32> to vector<2x32xf32>
    %159 = arith.addf %157, %158 : vector<2x32xf32>
    %160 = arith.negf %159 : vector<2x32xf32>
    %161 = math.exp %160 : vector<2x32xf32>
    %cst_46 = arith.constant 1.000000e+00 : f32
    %162 = vector.broadcast %cst_46 : f32 to vector<2x32xf32>
    %163 = arith.addf %162, %161 : vector<2x32xf32>
    %164 = arith.divf %162, %163 : vector<2x32xf32>
    %165 = vector.extract_strided_slice %148 {offsets = [0, 64], sizes = [2, 32], strides = [1, 1]} : vector<2x96xf32> to vector<2x32xf32>
    %166 = vector.extract_strided_slice %92 {offsets = [0, 64], sizes = [2, 32], strides = [1, 1]} : vector<2x96xf32> to vector<2x32xf32>
    %167 = arith.mulf %156, %166 : vector<2x32xf32>
    %168 = arith.addf %165, %167 : vector<2x32xf32>
    %169 = math.tanh %168 : vector<2x32xf32>
    %cst_47 = arith.constant 1.000000e+00 : f32
    %170 = vector.broadcast %cst_47 : f32 to vector<2x32xf32>
    %171 = arith.subf %170, %164 : vector<2x32xf32>
    %172 = arith.mulf %171, %169 : vector<2x32xf32>
    %173 = arith.mulf %164, %87 : vector<2x32xf32>
    %174 = arith.addf %172, %173 : vector<2x32xf32>
    %cst_48 = arith.constant dense<0.000000e+00> : vector<2x148xf32>
    %175 = tpu.matmul %174, %10, %cst_48 {dimension_numbers = #tpu.dot_dimension_numbers<[1], [0], [0], [1], [0, 0, 1, 1], [], []>} : vector<2x32xf32>, vector<32x148xf32>, vector<2x148xf32> -> vector<2x148xf32>
    %176 = vector.extract_strided_slice %175 {offsets = [0, 0], sizes = [2, 32], strides = [1, 1]} : vector<2x148xf32> to vector<2x32xf32>
    %177 = vector.extract_strided_slice %175 {offsets = [0, 32], sizes = [2, 96], strides = [1, 1]} : vector<2x148xf32> to vector<2x96xf32>
    %178 = vector.broadcast %13 : vector<1x96xf32> to vector<2x96xf32>
    %179 = arith.addf %177, %178 : vector<2x96xf32>
    %180 = vector.extract_strided_slice %175 {offsets = [0, 128], sizes = [2, 20], strides = [1, 1]} : vector<2x148xf32> to vector<2x20xf32>
    %181 = vector.broadcast %14 : vector<1x20xf32> to vector<2x20xf32>
    %182 = arith.addf %180, %181 : vector<2x20xf32>
    %c1_i32_49 = arith.constant 1 : i32
    %183 = vector.broadcast %c1_i32_49 : i32 to vector<2x6x20xi32>
    %184 = arith.cmpi eq, %1, %183 : vector<2x6x20xi32>
    %185 = vector.shape_cast %182 : vector<2x20xf32> to vector<2x1x20xf32>
    %186 = vector.shape_cast %185 : vector<2x1x20xf32> to vector<2x1x20xf32>
    %187 = vector.broadcast %186 : vector<2x1x20xf32> to vector<2x6x20xf32>
    %188 = arith.select %184, %187, %101 : vector<2x6x20xi1>, vector<2x6x20xf32>
    %cst_50 = arith.constant dense<0xFF800000> : vector<2xf32>
    %189 = vector.multi_reduction <maximumf>, %182, %cst_50 [1] : vector<2x20xf32> to vector<2xf32>
    %190 = vector.shape_cast %189 : vector<2xf32> to vector<2x1xf32>
    %191 = vector.broadcast %190 : vector<2x1xf32> to vector<2x20xf32>
    %192 = arith.cmpf oge, %182, %191 : vector<2x20xf32>
    %c20_i32_51 = arith.constant 20 : i32
    %193 = vector.broadcast %c20_i32_51 : i32 to vector<2x20xi32>
    %194 = arith.select %192, %0, %193 : vector<2x20xi1>, vector<2x20xi32>
    %cst_52 = arith.constant dense<2147483647> : vector<2xi32>
    %195 = vector.multi_reduction <minsi>, %194, %cst_52 [1] : vector<2x20xi32> to vector<2xi32>
    %196 = vector.shape_cast %195 : vector<2xi32> to vector<2x1xi32>
    %197 = vector.broadcast %196 : vector<2x1xi32> to vector<2x20xi32>
    %198 = arith.cmpi eq, %0, %197 : vector<2x20xi32>
    %199 = arith.extui %198 : vector<2x20xi1> to vector<2x20xi32>
    %200 = arith.sitofp %199 : vector<2x20xi32> to vector<2x20xf32>
    %cst_53 = arith.constant dense<0.000000e+00> : vector<2x48xf32>
    %201 = tpu.matmul %200, %9, %cst_53 {dimension_numbers = #tpu.dot_dimension_numbers<[1], [0], [0], [1], [0, 0, 1, 1], [], []>} : vector<2x20xf32>, vector<20x48xf32>, vector<2x48xf32> -> vector<2x48xf32>
    %cst_54 = arith.constant 0.000000e+00 : f32
    %202 = vector.broadcast %cst_54 : f32 to vector<2x48xf32>
    %203 = arith.maximumf %201, %202 : vector<2x48xf32>
    %204 = vector.shape_cast %176 : vector<2x32xf32> to vector<2x1x32xf32>
    %205 = vector.broadcast %204 : vector<2x1x32xf32> to vector<2x8x32xf32>
    %206 = arith.addf %205, %7 : vector<2x8x32xf32>
    %207 = math.tanh %206 : vector<2x8x32xf32>
    %208 = vector.shape_cast %8 : vector<1x32xf32> to vector<1x1x32xf32>
    %209 = vector.broadcast %208 : vector<1x1x32xf32> to vector<2x8x32xf32>
    %210 = arith.mulf %207, %209 : vector<2x8x32xf32>
    %cst_55 = arith.constant dense<0.000000e+00> : vector<2x8xf32>
    %211 = vector.multi_reduction <add>, %210, %cst_55 [2] : vector<2x8x32xf32> to vector<2x8xf32>
    %cst_56 = arith.constant dense<0xFF800000> : vector<2xf32>
    %212 = vector.multi_reduction <maximumf>, %211, %cst_56 [1] : vector<2x8xf32> to vector<2xf32>
    %213 = vector.shape_cast %212 : vector<2xf32> to vector<2x1xf32>
    %214 = vector.broadcast %213 : vector<2x1xf32> to vector<2x8xf32>
    %215 = arith.subf %211, %214 : vector<2x8xf32>
    %216 = math.exp %215 : vector<2x8xf32>
    %cst_57 = arith.constant dense<0.000000e+00> : vector<2xf32>
    %217 = vector.multi_reduction <add>, %216, %cst_57 [1] : vector<2x8xf32> to vector<2xf32>
    %218 = vector.shape_cast %217 : vector<2xf32> to vector<2x1xf32>
    %219 = tpu.reciprocal %218 : vector<2x1xf32> -> vector<2x1xf32>
    %220 = vector.broadcast %219 : vector<2x1xf32> to vector<2x8xf32>
    %221 = arith.mulf %216, %220 : vector<2x8xf32>
    %c2_i32 = arith.constant 2 : i32
    %222 = vector.broadcast %c2_i32 : i32 to vector<2x6x8xi32>
    %223 = arith.cmpi eq, %2, %222 : vector<2x6x8xi32>
    %224 = vector.shape_cast %221 : vector<2x8xf32> to vector<2x1x8xf32>
    %225 = vector.shape_cast %224 : vector<2x1x8xf32> to vector<2x1x8xf32>
    %226 = vector.broadcast %225 : vector<2x1x8xf32> to vector<2x6x8xf32>
    %227 = arith.select %223, %226, %140 : vector<2x6x8xi1>, vector<2x6x8xf32>
    %228 = vector.shape_cast %221 : vector<2x8xf32> to vector<2x8x1xf32>
    %229 = vector.broadcast %228 : vector<2x8x1xf32> to vector<2x8x48xf32>
    %230 = arith.mulf %229, %3 : vector<2x8x48xf32>
    %cst_58 = arith.constant dense<0.000000e+00> : vector<2x48xf32>
    %231 = vector.multi_reduction <add>, %230, %cst_58 [1] : vector<2x8x48xf32> to vector<2x48xf32>
    %232 = arith.addf %203, %231 : vector<2x48xf32>
    %cst_59 = arith.constant dense<0.000000e+00> : vector<2x96xf32>
    %233 = tpu.matmul %232, %11, %cst_59 {dimension_numbers = #tpu.dot_dimension_numbers<[1], [0], [0], [1], [0, 0, 1, 1], [], []>} : vector<2x48xf32>, vector<48x96xf32>, vector<2x96xf32> -> vector<2x96xf32>
    %234 = vector.broadcast %12 : vector<1x96xf32> to vector<2x96xf32>
    %235 = arith.addf %233, %234 : vector<2x96xf32>
    %236 = vector.extract_strided_slice %235 {offsets = [0, 0], sizes = [2, 32], strides = [1, 1]} : vector<2x96xf32> to vector<2x32xf32>
    %237 = vector.extract_strided_slice %179 {offsets = [0, 0], sizes = [2, 32], strides = [1, 1]} : vector<2x96xf32> to vector<2x32xf32>
    %238 = arith.addf %236, %237 : vector<2x32xf32>
    %239 = arith.negf %238 : vector<2x32xf32>
    %240 = math.exp %239 : vector<2x32xf32>
    %cst_60 = arith.constant 1.000000e+00 : f32
    %241 = vector.broadcast %cst_60 : f32 to vector<2x32xf32>
    %242 = arith.addf %241, %240 : vector<2x32xf32>
    %243 = arith.divf %241, %242 : vector<2x32xf32>
    %244 = vector.extract_strided_slice %235 {offsets = [0, 32], sizes = [2, 32], strides = [1, 1]} : vector<2x96xf32> to vector<2x32xf32>
    %245 = vector.extract_strided_slice %179 {offsets = [0, 32], sizes = [2, 32], strides = [1, 1]} : vector<2x96xf32> to vector<2x32xf32>
    %246 = arith.addf %244, %245 : vector<2x32xf32>
    %247 = arith.negf %246 : vector<2x32xf32>
    %248 = math.exp %247 : vector<2x32xf32>
    %cst_61 = arith.constant 1.000000e+00 : f32
    %249 = vector.broadcast %cst_61 : f32 to vector<2x32xf32>
    %250 = arith.addf %249, %248 : vector<2x32xf32>
    %251 = arith.divf %249, %250 : vector<2x32xf32>
    %252 = vector.extract_strided_slice %235 {offsets = [0, 64], sizes = [2, 32], strides = [1, 1]} : vector<2x96xf32> to vector<2x32xf32>
    %253 = vector.extract_strided_slice %179 {offsets = [0, 64], sizes = [2, 32], strides = [1, 1]} : vector<2x96xf32> to vector<2x32xf32>
    %254 = arith.mulf %243, %253 : vector<2x32xf32>
    %255 = arith.addf %252, %254 : vector<2x32xf32>
    %256 = math.tanh %255 : vector<2x32xf32>
    %cst_62 = arith.constant 1.000000e+00 : f32
    %257 = vector.broadcast %cst_62 : f32 to vector<2x32xf32>
    %258 = arith.subf %257, %251 : vector<2x32xf32>
    %259 = arith.mulf %258, %256 : vector<2x32xf32>
    %260 = arith.mulf %251, %174 : vector<2x32xf32>
    %261 = arith.addf %259, %260 : vector<2x32xf32>
    %cst_63 = arith.constant dense<0.000000e+00> : vector<2x148xf32>
    %262 = tpu.matmul %261, %10, %cst_63 {dimension_numbers = #tpu.dot_dimension_numbers<[1], [0], [0], [1], [0, 0, 1, 1], [], []>} : vector<2x32xf32>, vector<32x148xf32>, vector<2x148xf32> -> vector<2x148xf32>
    %263 = vector.extract_strided_slice %262 {offsets = [0, 0], sizes = [2, 32], strides = [1, 1]} : vector<2x148xf32> to vector<2x32xf32>
    %264 = vector.extract_strided_slice %262 {offsets = [0, 32], sizes = [2, 96], strides = [1, 1]} : vector<2x148xf32> to vector<2x96xf32>
    %265 = vector.broadcast %13 : vector<1x96xf32> to vector<2x96xf32>
    %266 = arith.addf %264, %265 : vector<2x96xf32>
    %267 = vector.extract_strided_slice %262 {offsets = [0, 128], sizes = [2, 20], strides = [1, 1]} : vector<2x148xf32> to vector<2x20xf32>
    %268 = vector.broadcast %14 : vector<1x20xf32> to vector<2x20xf32>
    %269 = arith.addf %267, %268 : vector<2x20xf32>
    %c2_i32_64 = arith.constant 2 : i32
    %270 = vector.broadcast %c2_i32_64 : i32 to vector<2x6x20xi32>
    %271 = arith.cmpi eq, %1, %270 : vector<2x6x20xi32>
    %272 = vector.shape_cast %269 : vector<2x20xf32> to vector<2x1x20xf32>
    %273 = vector.shape_cast %272 : vector<2x1x20xf32> to vector<2x1x20xf32>
    %274 = vector.broadcast %273 : vector<2x1x20xf32> to vector<2x6x20xf32>
    %275 = arith.select %271, %274, %188 : vector<2x6x20xi1>, vector<2x6x20xf32>
    %cst_65 = arith.constant dense<0xFF800000> : vector<2xf32>
    %276 = vector.multi_reduction <maximumf>, %269, %cst_65 [1] : vector<2x20xf32> to vector<2xf32>
    %277 = vector.shape_cast %276 : vector<2xf32> to vector<2x1xf32>
    %278 = vector.broadcast %277 : vector<2x1xf32> to vector<2x20xf32>
    %279 = arith.cmpf oge, %269, %278 : vector<2x20xf32>
    %c20_i32_66 = arith.constant 20 : i32
    %280 = vector.broadcast %c20_i32_66 : i32 to vector<2x20xi32>
    %281 = arith.select %279, %0, %280 : vector<2x20xi1>, vector<2x20xi32>
    %cst_67 = arith.constant dense<2147483647> : vector<2xi32>
    %282 = vector.multi_reduction <minsi>, %281, %cst_67 [1] : vector<2x20xi32> to vector<2xi32>
    %283 = vector.shape_cast %282 : vector<2xi32> to vector<2x1xi32>
    %284 = vector.broadcast %283 : vector<2x1xi32> to vector<2x20xi32>
    %285 = arith.cmpi eq, %0, %284 : vector<2x20xi32>
    %286 = arith.extui %285 : vector<2x20xi1> to vector<2x20xi32>
    %287 = arith.sitofp %286 : vector<2x20xi32> to vector<2x20xf32>
    %cst_68 = arith.constant dense<0.000000e+00> : vector<2x48xf32>
    %288 = tpu.matmul %287, %9, %cst_68 {dimension_numbers = #tpu.dot_dimension_numbers<[1], [0], [0], [1], [0, 0, 1, 1], [], []>} : vector<2x20xf32>, vector<20x48xf32>, vector<2x48xf32> -> vector<2x48xf32>
    %cst_69 = arith.constant 0.000000e+00 : f32
    %289 = vector.broadcast %cst_69 : f32 to vector<2x48xf32>
    %290 = arith.maximumf %288, %289 : vector<2x48xf32>
    %291 = vector.shape_cast %263 : vector<2x32xf32> to vector<2x1x32xf32>
    %292 = vector.broadcast %291 : vector<2x1x32xf32> to vector<2x8x32xf32>
    %293 = arith.addf %292, %7 : vector<2x8x32xf32>
    %294 = math.tanh %293 : vector<2x8x32xf32>
    %295 = vector.shape_cast %8 : vector<1x32xf32> to vector<1x1x32xf32>
    %296 = vector.broadcast %295 : vector<1x1x32xf32> to vector<2x8x32xf32>
    %297 = arith.mulf %294, %296 : vector<2x8x32xf32>
    %cst_70 = arith.constant dense<0.000000e+00> : vector<2x8xf32>
    %298 = vector.multi_reduction <add>, %297, %cst_70 [2] : vector<2x8x32xf32> to vector<2x8xf32>
    %cst_71 = arith.constant dense<0xFF800000> : vector<2xf32>
    %299 = vector.multi_reduction <maximumf>, %298, %cst_71 [1] : vector<2x8xf32> to vector<2xf32>
    %300 = vector.shape_cast %299 : vector<2xf32> to vector<2x1xf32>
    %301 = vector.broadcast %300 : vector<2x1xf32> to vector<2x8xf32>
    %302 = arith.subf %298, %301 : vector<2x8xf32>
    %303 = math.exp %302 : vector<2x8xf32>
    %cst_72 = arith.constant dense<0.000000e+00> : vector<2xf32>
    %304 = vector.multi_reduction <add>, %303, %cst_72 [1] : vector<2x8xf32> to vector<2xf32>
    %305 = vector.shape_cast %304 : vector<2xf32> to vector<2x1xf32>
    %306 = tpu.reciprocal %305 : vector<2x1xf32> -> vector<2x1xf32>
    %307 = vector.broadcast %306 : vector<2x1xf32> to vector<2x8xf32>
    %308 = arith.mulf %303, %307 : vector<2x8xf32>
    %c3_i32 = arith.constant 3 : i32
    %309 = vector.broadcast %c3_i32 : i32 to vector<2x6x8xi32>
    %310 = arith.cmpi eq, %2, %309 : vector<2x6x8xi32>
    %311 = vector.shape_cast %308 : vector<2x8xf32> to vector<2x1x8xf32>
    %312 = vector.shape_cast %311 : vector<2x1x8xf32> to vector<2x1x8xf32>
    %313 = vector.broadcast %312 : vector<2x1x8xf32> to vector<2x6x8xf32>
    %314 = arith.select %310, %313, %227 : vector<2x6x8xi1>, vector<2x6x8xf32>
    %315 = vector.shape_cast %308 : vector<2x8xf32> to vector<2x8x1xf32>
    %316 = vector.broadcast %315 : vector<2x8x1xf32> to vector<2x8x48xf32>
    %317 = arith.mulf %316, %3 : vector<2x8x48xf32>
    %cst_73 = arith.constant dense<0.000000e+00> : vector<2x48xf32>
    %318 = vector.multi_reduction <add>, %317, %cst_73 [1] : vector<2x8x48xf32> to vector<2x48xf32>
    %319 = arith.addf %290, %318 : vector<2x48xf32>
    %cst_74 = arith.constant dense<0.000000e+00> : vector<2x96xf32>
    %320 = tpu.matmul %319, %11, %cst_74 {dimension_numbers = #tpu.dot_dimension_numbers<[1], [0], [0], [1], [0, 0, 1, 1], [], []>} : vector<2x48xf32>, vector<48x96xf32>, vector<2x96xf32> -> vector<2x96xf32>
    %321 = vector.broadcast %12 : vector<1x96xf32> to vector<2x96xf32>
    %322 = arith.addf %320, %321 : vector<2x96xf32>
    %323 = vector.extract_strided_slice %322 {offsets = [0, 0], sizes = [2, 32], strides = [1, 1]} : vector<2x96xf32> to vector<2x32xf32>
    %324 = vector.extract_strided_slice %266 {offsets = [0, 0], sizes = [2, 32], strides = [1, 1]} : vector<2x96xf32> to vector<2x32xf32>
    %325 = arith.addf %323, %324 : vector<2x32xf32>
    %326 = arith.negf %325 : vector<2x32xf32>
    %327 = math.exp %326 : vector<2x32xf32>
    %cst_75 = arith.constant 1.000000e+00 : f32
    %328 = vector.broadcast %cst_75 : f32 to vector<2x32xf32>
    %329 = arith.addf %328, %327 : vector<2x32xf32>
    %330 = arith.divf %328, %329 : vector<2x32xf32>
    %331 = vector.extract_strided_slice %322 {offsets = [0, 32], sizes = [2, 32], strides = [1, 1]} : vector<2x96xf32> to vector<2x32xf32>
    %332 = vector.extract_strided_slice %266 {offsets = [0, 32], sizes = [2, 32], strides = [1, 1]} : vector<2x96xf32> to vector<2x32xf32>
    %333 = arith.addf %331, %332 : vector<2x32xf32>
    %334 = arith.negf %333 : vector<2x32xf32>
    %335 = math.exp %334 : vector<2x32xf32>
    %cst_76 = arith.constant 1.000000e+00 : f32
    %336 = vector.broadcast %cst_76 : f32 to vector<2x32xf32>
    %337 = arith.addf %336, %335 : vector<2x32xf32>
    %338 = arith.divf %336, %337 : vector<2x32xf32>
    %339 = vector.extract_strided_slice %322 {offsets = [0, 64], sizes = [2, 32], strides = [1, 1]} : vector<2x96xf32> to vector<2x32xf32>
    %340 = vector.extract_strided_slice %266 {offsets = [0, 64], sizes = [2, 32], strides = [1, 1]} : vector<2x96xf32> to vector<2x32xf32>
    %341 = arith.mulf %330, %340 : vector<2x32xf32>
    %342 = arith.addf %339, %341 : vector<2x32xf32>
    %343 = math.tanh %342 : vector<2x32xf32>
    %cst_77 = arith.constant 1.000000e+00 : f32
    %344 = vector.broadcast %cst_77 : f32 to vector<2x32xf32>
    %345 = arith.subf %344, %338 : vector<2x32xf32>
    %346 = arith.mulf %345, %343 : vector<2x32xf32>
    %347 = arith.mulf %338, %261 : vector<2x32xf32>
    %348 = arith.addf %346, %347 : vector<2x32xf32>
    %cst_78 = arith.constant dense<0.000000e+00> : vector<2x148xf32>
    %349 = tpu.matmul %348, %10, %cst_78 {dimension_numbers = #tpu.dot_dimension_numbers<[1], [0], [0], [1], [0, 0, 1, 1], [], []>} : vector<2x32xf32>, vector<32x148xf32>, vector<2x148xf32> -> vector<2x148xf32>
    %350 = vector.extract_strided_slice %349 {offsets = [0, 0], sizes = [2, 32], strides = [1, 1]} : vector<2x148xf32> to vector<2x32xf32>
    %351 = vector.extract_strided_slice %349 {offsets = [0, 32], sizes = [2, 96], strides = [1, 1]} : vector<2x148xf32> to vector<2x96xf32>
    %352 = vector.broadcast %13 : vector<1x96xf32> to vector<2x96xf32>
    %353 = arith.addf %351, %352 : vector<2x96xf32>
    %354 = vector.extract_strided_slice %349 {offsets = [0, 128], sizes = [2, 20], strides = [1, 1]} : vector<2x148xf32> to vector<2x20xf32>
    %355 = vector.broadcast %14 : vector<1x20xf32> to vector<2x20xf32>
    %356 = arith.addf %354, %355 : vector<2x20xf32>
    %c3_i32_79 = arith.constant 3 : i32
    %357 = vector.broadcast %c3_i32_79 : i32 to vector<2x6x20xi32>
    %358 = arith.cmpi eq, %1, %357 : vector<2x6x20xi32>
    %359 = vector.shape_cast %356 : vector<2x20xf32> to vector<2x1x20xf32>
    %360 = vector.shape_cast %359 : vector<2x1x20xf32> to vector<2x1x20xf32>
    %361 = vector.broadcast %360 : vector<2x1x20xf32> to vector<2x6x20xf32>
    %362 = arith.select %358, %361, %275 : vector<2x6x20xi1>, vector<2x6x20xf32>
    %cst_80 = arith.constant dense<0xFF800000> : vector<2xf32>
    %363 = vector.multi_reduction <maximumf>, %356, %cst_80 [1] : vector<2x20xf32> to vector<2xf32>
    %364 = vector.shape_cast %363 : vector<2xf32> to vector<2x1xf32>
    %365 = vector.broadcast %364 : vector<2x1xf32> to vector<2x20xf32>
    %366 = arith.cmpf oge, %356, %365 : vector<2x20xf32>
    %c20_i32_81 = arith.constant 20 : i32
    %367 = vector.broadcast %c20_i32_81 : i32 to vector<2x20xi32>
    %368 = arith.select %366, %0, %367 : vector<2x20xi1>, vector<2x20xi32>
    %cst_82 = arith.constant dense<2147483647> : vector<2xi32>
    %369 = vector.multi_reduction <minsi>, %368, %cst_82 [1] : vector<2x20xi32> to vector<2xi32>
    %370 = vector.shape_cast %369 : vector<2xi32> to vector<2x1xi32>
    %371 = vector.broadcast %370 : vector<2x1xi32> to vector<2x20xi32>
    %372 = arith.cmpi eq, %0, %371 : vector<2x20xi32>
    %373 = arith.extui %372 : vector<2x20xi1> to vector<2x20xi32>
    %374 = arith.sitofp %373 : vector<2x20xi32> to vector<2x20xf32>
    %cst_83 = arith.constant dense<0.000000e+00> : vector<2x48xf32>
    %375 = tpu.matmul %374, %9, %cst_83 {dimension_numbers = #tpu.dot_dimension_numbers<[1], [0], [0], [1], [0, 0, 1, 1], [], []>} : vector<2x20xf32>, vector<20x48xf32>, vector<2x48xf32> -> vector<2x48xf32>
    %cst_84 = arith.constant 0.000000e+00 : f32
    %376 = vector.broadcast %cst_84 : f32 to vector<2x48xf32>
    %377 = arith.maximumf %375, %376 : vector<2x48xf32>
    %378 = vector.shape_cast %350 : vector<2x32xf32> to vector<2x1x32xf32>
    %379 = vector.broadcast %378 : vector<2x1x32xf32> to vector<2x8x32xf32>
    %380 = arith.addf %379, %7 : vector<2x8x32xf32>
    %381 = math.tanh %380 : vector<2x8x32xf32>
    %382 = vector.shape_cast %8 : vector<1x32xf32> to vector<1x1x32xf32>
    %383 = vector.broadcast %382 : vector<1x1x32xf32> to vector<2x8x32xf32>
    %384 = arith.mulf %381, %383 : vector<2x8x32xf32>
    %cst_85 = arith.constant dense<0.000000e+00> : vector<2x8xf32>
    %385 = vector.multi_reduction <add>, %384, %cst_85 [2] : vector<2x8x32xf32> to vector<2x8xf32>
    %cst_86 = arith.constant dense<0xFF800000> : vector<2xf32>
    %386 = vector.multi_reduction <maximumf>, %385, %cst_86 [1] : vector<2x8xf32> to vector<2xf32>
    %387 = vector.shape_cast %386 : vector<2xf32> to vector<2x1xf32>
    %388 = vector.broadcast %387 : vector<2x1xf32> to vector<2x8xf32>
    %389 = arith.subf %385, %388 : vector<2x8xf32>
    %390 = math.exp %389 : vector<2x8xf32>
    %cst_87 = arith.constant dense<0.000000e+00> : vector<2xf32>
    %391 = vector.multi_reduction <add>, %390, %cst_87 [1] : vector<2x8xf32> to vector<2xf32>
    %392 = vector.shape_cast %391 : vector<2xf32> to vector<2x1xf32>
    %393 = tpu.reciprocal %392 : vector<2x1xf32> -> vector<2x1xf32>
    %394 = vector.broadcast %393 : vector<2x1xf32> to vector<2x8xf32>
    %395 = arith.mulf %390, %394 : vector<2x8xf32>
    %c4_i32 = arith.constant 4 : i32
    %396 = vector.broadcast %c4_i32 : i32 to vector<2x6x8xi32>
    %397 = arith.cmpi eq, %2, %396 : vector<2x6x8xi32>
    %398 = vector.shape_cast %395 : vector<2x8xf32> to vector<2x1x8xf32>
    %399 = vector.shape_cast %398 : vector<2x1x8xf32> to vector<2x1x8xf32>
    %400 = vector.broadcast %399 : vector<2x1x8xf32> to vector<2x6x8xf32>
    %401 = arith.select %397, %400, %314 : vector<2x6x8xi1>, vector<2x6x8xf32>
    %402 = vector.shape_cast %395 : vector<2x8xf32> to vector<2x8x1xf32>
    %403 = vector.broadcast %402 : vector<2x8x1xf32> to vector<2x8x48xf32>
    %404 = arith.mulf %403, %3 : vector<2x8x48xf32>
    %cst_88 = arith.constant dense<0.000000e+00> : vector<2x48xf32>
    %405 = vector.multi_reduction <add>, %404, %cst_88 [1] : vector<2x8x48xf32> to vector<2x48xf32>
    %406 = arith.addf %377, %405 : vector<2x48xf32>
    %cst_89 = arith.constant dense<0.000000e+00> : vector<2x96xf32>
    %407 = tpu.matmul %406, %11, %cst_89 {dimension_numbers = #tpu.dot_dimension_numbers<[1], [0], [0], [1], [0, 0, 1, 1], [], []>} : vector<2x48xf32>, vector<48x96xf32>, vector<2x96xf32> -> vector<2x96xf32>
    %408 = vector.broadcast %12 : vector<1x96xf32> to vector<2x96xf32>
    %409 = arith.addf %407, %408 : vector<2x96xf32>
    %410 = vector.extract_strided_slice %409 {offsets = [0, 0], sizes = [2, 32], strides = [1, 1]} : vector<2x96xf32> to vector<2x32xf32>
    %411 = vector.extract_strided_slice %353 {offsets = [0, 0], sizes = [2, 32], strides = [1, 1]} : vector<2x96xf32> to vector<2x32xf32>
    %412 = arith.addf %410, %411 : vector<2x32xf32>
    %413 = arith.negf %412 : vector<2x32xf32>
    %414 = math.exp %413 : vector<2x32xf32>
    %cst_90 = arith.constant 1.000000e+00 : f32
    %415 = vector.broadcast %cst_90 : f32 to vector<2x32xf32>
    %416 = arith.addf %415, %414 : vector<2x32xf32>
    %417 = arith.divf %415, %416 : vector<2x32xf32>
    %418 = vector.extract_strided_slice %409 {offsets = [0, 32], sizes = [2, 32], strides = [1, 1]} : vector<2x96xf32> to vector<2x32xf32>
    %419 = vector.extract_strided_slice %353 {offsets = [0, 32], sizes = [2, 32], strides = [1, 1]} : vector<2x96xf32> to vector<2x32xf32>
    %420 = arith.addf %418, %419 : vector<2x32xf32>
    %421 = arith.negf %420 : vector<2x32xf32>
    %422 = math.exp %421 : vector<2x32xf32>
    %cst_91 = arith.constant 1.000000e+00 : f32
    %423 = vector.broadcast %cst_91 : f32 to vector<2x32xf32>
    %424 = arith.addf %423, %422 : vector<2x32xf32>
    %425 = arith.divf %423, %424 : vector<2x32xf32>
    %426 = vector.extract_strided_slice %409 {offsets = [0, 64], sizes = [2, 32], strides = [1, 1]} : vector<2x96xf32> to vector<2x32xf32>
    %427 = vector.extract_strided_slice %353 {offsets = [0, 64], sizes = [2, 32], strides = [1, 1]} : vector<2x96xf32> to vector<2x32xf32>
    %428 = arith.mulf %417, %427 : vector<2x32xf32>
    %429 = arith.addf %426, %428 : vector<2x32xf32>
    %430 = math.tanh %429 : vector<2x32xf32>
    %cst_92 = arith.constant 1.000000e+00 : f32
    %431 = vector.broadcast %cst_92 : f32 to vector<2x32xf32>
    %432 = arith.subf %431, %425 : vector<2x32xf32>
    %433 = arith.mulf %432, %430 : vector<2x32xf32>
    %434 = arith.mulf %425, %348 : vector<2x32xf32>
    %435 = arith.addf %433, %434 : vector<2x32xf32>
    %cst_93 = arith.constant dense<0.000000e+00> : vector<2x148xf32>
    %436 = tpu.matmul %435, %10, %cst_93 {dimension_numbers = #tpu.dot_dimension_numbers<[1], [0], [0], [1], [0, 0, 1, 1], [], []>} : vector<2x32xf32>, vector<32x148xf32>, vector<2x148xf32> -> vector<2x148xf32>
    %437 = vector.extract_strided_slice %436 {offsets = [0, 0], sizes = [2, 32], strides = [1, 1]} : vector<2x148xf32> to vector<2x32xf32>
    %438 = vector.extract_strided_slice %436 {offsets = [0, 32], sizes = [2, 96], strides = [1, 1]} : vector<2x148xf32> to vector<2x96xf32>
    %439 = vector.broadcast %13 : vector<1x96xf32> to vector<2x96xf32>
    %440 = arith.addf %438, %439 : vector<2x96xf32>
    %441 = vector.extract_strided_slice %436 {offsets = [0, 128], sizes = [2, 20], strides = [1, 1]} : vector<2x148xf32> to vector<2x20xf32>
    %442 = vector.broadcast %14 : vector<1x20xf32> to vector<2x20xf32>
    %443 = arith.addf %441, %442 : vector<2x20xf32>
    %c4_i32_94 = arith.constant 4 : i32
    %444 = vector.broadcast %c4_i32_94 : i32 to vector<2x6x20xi32>
    %445 = arith.cmpi eq, %1, %444 : vector<2x6x20xi32>
    %446 = vector.shape_cast %443 : vector<2x20xf32> to vector<2x1x20xf32>
    %447 = vector.shape_cast %446 : vector<2x1x20xf32> to vector<2x1x20xf32>
    %448 = vector.broadcast %447 : vector<2x1x20xf32> to vector<2x6x20xf32>
    %449 = arith.select %445, %448, %362 : vector<2x6x20xi1>, vector<2x6x20xf32>
    %cst_95 = arith.constant dense<0xFF800000> : vector<2xf32>
    %450 = vector.multi_reduction <maximumf>, %443, %cst_95 [1] : vector<2x20xf32> to vector<2xf32>
    %451 = vector.shape_cast %450 : vector<2xf32> to vector<2x1xf32>
    %452 = vector.broadcast %451 : vector<2x1xf32> to vector<2x20xf32>
    %453 = arith.cmpf oge, %443, %452 : vector<2x20xf32>
    %c20_i32_96 = arith.constant 20 : i32
    %454 = vector.broadcast %c20_i32_96 : i32 to vector<2x20xi32>
    %455 = arith.select %453, %0, %454 : vector<2x20xi1>, vector<2x20xi32>
    %cst_97 = arith.constant dense<2147483647> : vector<2xi32>
    %456 = vector.multi_reduction <minsi>, %455, %cst_97 [1] : vector<2x20xi32> to vector<2xi32>
    %457 = vector.shape_cast %456 : vector<2xi32> to vector<2x1xi32>
    %458 = vector.broadcast %457 : vector<2x1xi32> to vector<2x20xi32>
    %459 = arith.cmpi eq, %0, %458 : vector<2x20xi32>
    %460 = arith.extui %459 : vector<2x20xi1> to vector<2x20xi32>
    %461 = arith.sitofp %460 : vector<2x20xi32> to vector<2x20xf32>
    %cst_98 = arith.constant dense<0.000000e+00> : vector<2x48xf32>
    %462 = tpu.matmul %461, %9, %cst_98 {dimension_numbers = #tpu.dot_dimension_numbers<[1], [0], [0], [1], [0, 0, 1, 1], [], []>} : vector<2x20xf32>, vector<20x48xf32>, vector<2x48xf32> -> vector<2x48xf32>
    %cst_99 = arith.constant 0.000000e+00 : f32
    %463 = vector.broadcast %cst_99 : f32 to vector<2x48xf32>
    %464 = arith.maximumf %462, %463 : vector<2x48xf32>
    %465 = vector.shape_cast %437 : vector<2x32xf32> to vector<2x1x32xf32>
    %466 = vector.broadcast %465 : vector<2x1x32xf32> to vector<2x8x32xf32>
    %467 = arith.addf %466, %7 : vector<2x8x32xf32>
    %468 = math.tanh %467 : vector<2x8x32xf32>
    %469 = vector.shape_cast %8 : vector<1x32xf32> to vector<1x1x32xf32>
    %470 = vector.broadcast %469 : vector<1x1x32xf32> to vector<2x8x32xf32>
    %471 = arith.mulf %468, %470 : vector<2x8x32xf32>
    %cst_100 = arith.constant dense<0.000000e+00> : vector<2x8xf32>
    %472 = vector.multi_reduction <add>, %471, %cst_100 [2] : vector<2x8x32xf32> to vector<2x8xf32>
    %cst_101 = arith.constant dense<0xFF800000> : vector<2xf32>
    %473 = vector.multi_reduction <maximumf>, %472, %cst_101 [1] : vector<2x8xf32> to vector<2xf32>
    %474 = vector.shape_cast %473 : vector<2xf32> to vector<2x1xf32>
    %475 = vector.broadcast %474 : vector<2x1xf32> to vector<2x8xf32>
    %476 = arith.subf %472, %475 : vector<2x8xf32>
    %477 = math.exp %476 : vector<2x8xf32>
    %cst_102 = arith.constant dense<0.000000e+00> : vector<2xf32>
    %478 = vector.multi_reduction <add>, %477, %cst_102 [1] : vector<2x8xf32> to vector<2xf32>
    %479 = vector.shape_cast %478 : vector<2xf32> to vector<2x1xf32>
    %480 = tpu.reciprocal %479 : vector<2x1xf32> -> vector<2x1xf32>
    %481 = vector.broadcast %480 : vector<2x1xf32> to vector<2x8xf32>
    %482 = arith.mulf %477, %481 : vector<2x8xf32>
    %c5_i32 = arith.constant 5 : i32
    %483 = vector.broadcast %c5_i32 : i32 to vector<2x6x8xi32>
    %484 = arith.cmpi eq, %2, %483 : vector<2x6x8xi32>
    %485 = vector.shape_cast %482 : vector<2x8xf32> to vector<2x1x8xf32>
    %486 = vector.shape_cast %485 : vector<2x1x8xf32> to vector<2x1x8xf32>
    %487 = vector.broadcast %486 : vector<2x1x8xf32> to vector<2x6x8xf32>
    %488 = arith.select %484, %487, %401 : vector<2x6x8xi1>, vector<2x6x8xf32>
    %489 = vector.shape_cast %482 : vector<2x8xf32> to vector<2x8x1xf32>
    %490 = vector.broadcast %489 : vector<2x8x1xf32> to vector<2x8x48xf32>
    %491 = arith.mulf %490, %3 : vector<2x8x48xf32>
    %cst_103 = arith.constant dense<0.000000e+00> : vector<2x48xf32>
    %492 = vector.multi_reduction <add>, %491, %cst_103 [1] : vector<2x8x48xf32> to vector<2x48xf32>
    %493 = arith.addf %464, %492 : vector<2x48xf32>
    %cst_104 = arith.constant dense<0.000000e+00> : vector<2x96xf32>
    %494 = tpu.matmul %493, %11, %cst_104 {dimension_numbers = #tpu.dot_dimension_numbers<[1], [0], [0], [1], [0, 0, 1, 1], [], []>} : vector<2x48xf32>, vector<48x96xf32>, vector<2x96xf32> -> vector<2x96xf32>
    %495 = vector.broadcast %12 : vector<1x96xf32> to vector<2x96xf32>
    %496 = arith.addf %494, %495 : vector<2x96xf32>
    %497 = vector.extract_strided_slice %496 {offsets = [0, 0], sizes = [2, 32], strides = [1, 1]} : vector<2x96xf32> to vector<2x32xf32>
    %498 = vector.extract_strided_slice %440 {offsets = [0, 0], sizes = [2, 32], strides = [1, 1]} : vector<2x96xf32> to vector<2x32xf32>
    %499 = arith.addf %497, %498 : vector<2x32xf32>
    %500 = arith.negf %499 : vector<2x32xf32>
    %501 = math.exp %500 : vector<2x32xf32>
    %cst_105 = arith.constant 1.000000e+00 : f32
    %502 = vector.broadcast %cst_105 : f32 to vector<2x32xf32>
    %503 = arith.addf %502, %501 : vector<2x32xf32>
    %504 = arith.divf %502, %503 : vector<2x32xf32>
    %505 = vector.extract_strided_slice %496 {offsets = [0, 32], sizes = [2, 32], strides = [1, 1]} : vector<2x96xf32> to vector<2x32xf32>
    %506 = vector.extract_strided_slice %440 {offsets = [0, 32], sizes = [2, 32], strides = [1, 1]} : vector<2x96xf32> to vector<2x32xf32>
    %507 = arith.addf %505, %506 : vector<2x32xf32>
    %508 = arith.negf %507 : vector<2x32xf32>
    %509 = math.exp %508 : vector<2x32xf32>
    %cst_106 = arith.constant 1.000000e+00 : f32
    %510 = vector.broadcast %cst_106 : f32 to vector<2x32xf32>
    %511 = arith.addf %510, %509 : vector<2x32xf32>
    %512 = arith.divf %510, %511 : vector<2x32xf32>
    %513 = vector.extract_strided_slice %496 {offsets = [0, 64], sizes = [2, 32], strides = [1, 1]} : vector<2x96xf32> to vector<2x32xf32>
    %514 = vector.extract_strided_slice %440 {offsets = [0, 64], sizes = [2, 32], strides = [1, 1]} : vector<2x96xf32> to vector<2x32xf32>
    %515 = arith.mulf %504, %514 : vector<2x32xf32>
    %516 = arith.addf %513, %515 : vector<2x32xf32>
    %517 = math.tanh %516 : vector<2x32xf32>
    %cst_107 = arith.constant 1.000000e+00 : f32
    %518 = vector.broadcast %cst_107 : f32 to vector<2x32xf32>
    %519 = arith.subf %518, %512 : vector<2x32xf32>
    %520 = arith.mulf %519, %517 : vector<2x32xf32>
    %521 = arith.mulf %512, %435 : vector<2x32xf32>
    %522 = arith.addf %520, %521 : vector<2x32xf32>
    %523 = vector.extract_strided_slice %10 {offsets = [0, 128], sizes = [32, 20], strides = [1, 1]} : vector<32x148xf32> to vector<32x20xf32>
    %cst_108 = arith.constant dense<0.000000e+00> : vector<2x20xf32>
    %524 = tpu.matmul %522, %523, %cst_108 {dimension_numbers = #tpu.dot_dimension_numbers<[1], [0], [0], [1], [0, 0, 1, 1], [], []>} : vector<2x32xf32>, vector<32x20xf32>, vector<2x20xf32> -> vector<2x20xf32>
    %525 = vector.broadcast %14 : vector<1x20xf32> to vector<2x20xf32>
    %526 = arith.addf %524, %525 : vector<2x20xf32>
    %c5_i32_109 = arith.constant 5 : i32
    %527 = vector.broadcast %c5_i32_109 : i32 to vector<2x6x20xi32>
    %528 = arith.cmpi eq, %1, %527 : vector<2x6x20xi32>
    %529 = vector.shape_cast %526 : vector<2x20xf32> to vector<2x1x20xf32>
    %530 = vector.shape_cast %529 : vector<2x1x20xf32> to vector<2x1x20xf32>
    %531 = vector.broadcast %530 : vector<2x1x20xf32> to vector<2x6x20xf32>
    %532 = arith.select %528, %531, %449 : vector<2x6x20xi1>, vector<2x6x20xf32>
    %c0_110 = arith.constant 0 : index
    %c0_111 = arith.constant 0 : index
    %c0_112 = arith.constant 0 : index
    %533 = vector.load %arg10[%c0_110, %c0_111, %c0_112] : memref<2x6x20xf32, #tpu.memory_space<vmem>>, vector<2x6x20xf32>
    tpu.vector_store %arg10[%c0_110, %c0_111, %c0_112], %532 {strides = array<i32>} : memref<2x6x20xf32, #tpu.memory_space<vmem>>, vector<2x6x20xf32>,
    %c0_113 = arith.constant 0 : index
    %c0_114 = arith.constant 0 : index
    %c0_115 = arith.constant 0 : index
    %534 = vector.load %arg11[%c0_113, %c0_114, %c0_115] : memref<2x6x8xf32, #tpu.memory_space<vmem>>, vector<2x6x8xf32>
    tpu.vector_store %arg11[%c0_113, %c0_114, %c0_115], %488 {strides = array<i32>} : memref<2x6x8xf32, #tpu.memory_space<vmem>>, vector<2x6x8xf32>,
    %c0_116 = arith.constant 0 : index
    %c0_117 = arith.constant 0 : index
    %535 = vector.load %arg12[%c0_116, %c0_117] : memref<2x32xf32, #tpu.memory_space<vmem>>, vector<2x32xf32>
    tpu.vector_store %arg12[%c0_116, %c0_117], %522 {strides = array<i32>} : memref<2x32xf32, #tpu.memory_space<vmem>>, vector<2x32xf32>,
    return
  }
}

</mosaic_0001>

<bundles_post_ra>
// kernel: tpu_custom_call.1
= control target key start
LH: loop header
LB: loop body
LE: loop exit
PB: predicated region body
PF: predicated region fallthrough
CT: control target
= control target key end

     0   :  { %18 = vsyncpa [#allocation3], 0  ;;  %s4648_s0 = inlined_call_operand.hbm [shape: f32[2,8,48], index: 0, kind: input, shape index: {}]   ;;  %s4649_s1 = inlined_call_operand.vmem [shape: f32[2,32], index: 1, kind: input, shape index: {}]   ;;  %s4650_s2 = inlined_call_operand.vmem [shape: f32[20,48], index: 2, kind: input, shape index: {}]   ;;  %s4651_s3 = inlined_call_operand.vmem [shape: f32[48,32], index: 3, kind: input, shape index: {}]   ;;  %s4652_s4 = inlined_call_operand.vmem [shape: f32[1,32], index: 4, kind: input, shape index: {}]   ;;  %s4653_s5 = inlined_call_operand.vmem [shape: f32[32,148], index: 5, kind: input, shape index: {}]   ;;  %s4654_s6 = inlined_call_operand.hbm [shape: f32[48,96], index: 6, kind: input, shape index: {}]   ;;  %s4655_s7 = inlined_call_operand.vmem [shape: f32[1,96], index: 7, kind: input, shape index: {}]   ;;  %s4656_s8 = inlined_call_operand.vmem [shape: f32[1,96], index: 8, kind: input, shape index: {}]   ;;  %s4657_s9 = inlined_call_operand.vmem [shape: f32[1,20], index: 9, kind: input, shape index: {}]   ;;  %s4658_s10 = inlined_call_operand.vmem [shape: f32[2,6,20], index: 10, kind: output, shape index: {0}]   ;;  %s4659_s11 = inlined_call_operand.vmem [shape: f32[2,6,8], index: 11, kind: output, shape index: {1}]   ;;  %s4660_s12 = inlined_call_operand.hbm [shape: f32[2,32], index: 12, kind: output, shape index: {2}]  }
   0x1   :  { %19 = vsyncpa [#allocation6], 0 }
   0x2   :  { %20 = vsyncpa [#allocation4], 0  ;;  %s3784_s21 = smov [#allocation2]   ;;  %s3712_s25 = scalar_lea.hbm %s4648_s0, 256 }
   0x3   :  { %s26_s22 = sshll.u32 %s3784_s21, 4  ;;  %p3713_p0 = scmp.ne.s32.totalorder %s4648_s0, %s3712_s25  ;;  %s27_s22 = int_to_ptr.vmem [resolvable:$true] %s26_s22 }
   0x4   :  { %p3716_p1 = scmp.lt.u32.totalorder %s3712_s25, %s4648_s0 }
   0x6   :  { %p3718_p2 = pnand %p3716_p1, %p3713_p0 }
   0x8   :  { %3721 = shalt.err (!%p3718_p2)
}
   0x9   :  { %s3722_s30 = scalar_lea.vmem %s27_s22, 256  ;;  %p3727_p4 = scmp.lt.s32.totalorder %s27_s22, %s27_s22 }
   0xa   :  { %p3723_p3 = scmp.ne.s32.totalorder %s27_s22, %s3722_s30  ;;  %p3728_p5 = scmp.lt.s32.totalorder %s3722_s30, %s3722_s30 }
   0xc   :  { %p3729_p6 = por %p3728_p5, %p3727_p4 }
   0xe   :  { %p3730_p7 = pnand %p3729_p6, %p3723_p3 }
  0x10   :  { %3733 = shalt.err (!%p3730_p7)
}
  0x11   :  { %s3785_s13 = smov 128   ;;  %s3786_s14 = smov 8  }
  0x12   :  { %32 = dma.hbm_to_vmem [thread:$0]  %s4648_s0, 256, %s27_s22, [#allocation3], %s3785_s13, %s3785_s13, %s3786_s14  }
  0x13   :  { %s3787_s17 = smov [#allocation5]   ;;  %s3734_s21 = scalar_lea.hbm %s4654_s6, 768 }
  0x14   :  { %s48_s18 = sshll.u32 %s3787_s17, 4  ;;  %p3735_p8 = scmp.ne.s32.totalorder %s4654_s6, %s3734_s21  ;;  %s49_s18 = int_to_ptr.vmem [resolvable:$true] %s48_s18 }
  0x15   :  { %p3738_p9 = scmp.lt.u32.totalorder %s3734_s21, %s4654_s6 }
  0x17   :  { %p3740_p10 = pnand %p3738_p9, %p3735_p8 }
  0x19   :  { %3743 = shalt.err (!%p3740_p10)
}
  0x1a   :  { %s3744_s27 = scalar_lea.vmem %s49_s18, 768  ;;  %p3749_p12 = scmp.lt.s32.totalorder %s49_s18, %s49_s18 }
  0x1b   :  { %p3745_p11 = scmp.ne.s32.totalorder %s49_s18, %s3744_s27  ;;  %p3750_p13 = scmp.lt.s32.totalorder %s3744_s27, %s3744_s27 }
  0x1d   :  { %p3751_p0 = por %p3750_p13, %p3749_p12 }
  0x1f   :  { %p3752_p1 = pnand %p3751_p0, %p3745_p11 }
  0x21   :  { %3755 = shalt.err (!%p3752_p1)
}
  0x22   :  { %54 = dma.hbm_to_vmem [thread:$0]  %s4654_s6, 768, %s49_s18, [#allocation6], %s3785_s13, %s3785_s13, %s3786_s14  }
  0x23   :  { %3778 = dma.done.wait [#allocation3], 256  }
  0x24   :  { %3779 = vsyncadd [#allocation3], 4294967040 }
  0x25   :  { %3780 = dma.done.wait [#allocation6], 768  }
  0x26   :  { %3781 = vsyncadd [#allocation6], 4294966528  ;;  %v3788_v0 = vmov 0.0   ;;  %v73_v1 = vld [vmem:[%s4651_s3] sm:$0xff]  ;;  %v74_v2 = vld [vmem:[%s4651_s3 + $0x8] sm:$0xff]  ;;  %vm79_vm0 = vcmask 392192   ;;  %v67_v25 = vlaneseq }
  0x27   :  { %254 = vmatprep.mubr.f32.mxu1 %v3788_v0  ;;  %v166_v3 = vld [vmem:[%s4653_s5 + $0x8] sm:$0xff]  ;;  %v3457_v4 = vpack.c.bf16 %v74_v2, %v73_v1  ;;  %v168_v5 = vld [vmem:[%s4653_s5 + $0x18] sm:$0xff]  ;;  %v165_v6 = vld [vmem:[%s4653_s5] sm:$0xff]  ;;  %vm186_vm1 = vcmask 261120   ;;  %v3789_v26 = vmov 1966171168  }
  0x28   :  { %v167_v7 = vld [vmem:[%s4653_s5 + $0x10] sm:$0xff]  ;;  %v3905_v8 = vpack.c.bf16 %v168_v5, %v166_v3  ;;  %v76_v11 = vld [vmem:[%s4651_s3 + $0x18] sm:$0xff]  ;;  %v170_v12 = vld [vmem:[%s4653_s5 + $0x28] sm:$0xff]  ;;  %v350_v27 = vunpack.c.l.s4 %v3789_v26  ;;  %v3956_v28 = vshrl.u32 %v67_v25, 7  ;;  %v3987_v51 = vand.u32 127, %v67_v25  ;;  %s3793_s27 = smov 32  }
  0x29   :  { %v3907_v9 = vpack.c.bf16 %v167_v7, %v165_v6  ;;  %v75_v10 = vld [vmem:[%s4651_s3 + $0x10] sm:$0xff]  ;;  %3458 = vmatprep.subr.bf16.mxu0 %v3457_v4  ;;  %v172_v14 = vld [vmem:[%s4653_s5 + $0x38] sm:$0xff]  ;;  %v169_v15 = vld [vmem:[%s4653_s5 + $0x20] sm:$0xff]  ;;  %vm409_vm2 = vcmask 1041409   ;;  %vm412_vm3 = vcmask 58368   ;;  %v3790_v59 = vmov 0  }
  0x2a   :  { %v3461_v13 = vpack.c.bf16 %v76_v11, %v75_v10  ;;  %v171_v16 = vld [vmem:[%s4653_s5 + $0x30] sm:$0xff]  ;;  %3470 = vmatprep.subr.bf16.mxu1 %v3905_v8  ;;  %3460 = vmatpush3.bf16.msra.mxu0 %v3457_v4  ;;  %v3928_v17 = vpack.c.bf16 %v172_v14, %v170_v12  ;;  %v77_v18 = vld [vmem:[%s4651_s3 + $0x20] sm:$0xff]  ;;  %v78_v19 = vld [vmem:[%s4651_s3 + $0x28] sm:$0xff]  ;;  %v351_v29 = vunpack.c.0.s8 %v350_v27  ;;  %v3966_v33 = vsub.s32 0, %v3956_v28  ;;  %s3795_s28 = smov 64  }
  0x2b   :  { %3472 = vmatpush1.bf16.msra.mxu1 %v3907_v9  ;;  %v3937_v20 = vpack.c.bf16 %v171_v16, %v169_v15  ;;  %v3465_v21 = vpack.c.bf16 %v78_v19, %v77_v18  ;;  %v3939_v22 = vld [vmem:[#allocation2] sm:$0xff]  ;;  %v3952_v24 = vld [vmem:[#allocation2 + $0x8] sm:$0xff]  ;;  %v3991_v53 = vsub.s32 %v3987_v51, %v3956_v28  ;;  %3609 = vset.pattern.permute.xlu0 %v3790_v59  ;;  %v3998_v60 = vsub.s32 1, %v3956_v28 }
  0x2c   :  { %3462 = vmatprep.subr.bf16.mxu0 %v3461_v13  ;;  %3474 = vmatprep.subr.bf16.mxu1 %v3928_v17  ;;  %v3948_v23 = vld [vmem:[%s4649_s1] sm:$0x3]  ;;  %v3959_v30 = vsub.s32 %v351_v29, %v3956_v28  ;;  %v163_v10 = vld [vmem:[%s4650_s2 + $0x8] sm:$0xff]  ;;  %v3791_v11 = vmov 0.0|0.0   ;;  %vm3792_vm4 = vmmov 0   ;;  %vm183_vm5 = vcmp.eq.s32.totalorder %v3987_v51, 1 }
  0x2d   :  { %3299 = vmatprep.mubr.msk.f32.mxu0 %vm79_vm0, %v3939_v22  ;;  %v3981_v44 = vld [vmem:[%s4652_s4] ss:$0 sm:$0xff]  ;;  %3608 = vset.pattern.permute.xlu1 %v3790_v59  ;;  %vm273_vm6 = vcmask 1043456   ;;  %v3167_v14 = vsel %vm183_vm5, 1.0, %v3788_v0  ;;  %vm269_vm7 = vcmask 162816   ;;  %vm754_vm8 = vcmask 156672  }
  0x2e   :  { %3464 = vmatpush3.bf16.msra.mxu0 %v3461_v13  ;;  %v162_v7 = vld [vmem:[%s4650_s2] sm:$0xff]  ;;  %v4022_v13 = vld [vmem:[%s4650_s2 + $0x10] sm:$0xf]  ;;  %vm468_vm15 = vcmp.eq.s32.totalorder %v3956_v28, 0  ;;  %vm964_vm5 = vcmp.eq.s32.totalorder %v3956_v28, 1 }
  0x2f   :  { %3476 = vmatpush1.bf16.msra.mxu1 %v3937_v20  ;;  %3466 = vmatprep.subr.bf16.mxu0 %v3465_v21  ;;  %v4009_v12 = vpack.c.bf16 %v163_v10, %v162_v7  ;;  %v3169_v26 = vld [vmem:[%s4656_s8] ss:$0 sm:$0xff]  ;;  %s3794_s8 = smov 96  }
  0x30   :  { %3477 = vmatprep.subr.bf16.mxu1 %v3791_v11 }
  0x32   :  { %3168 = vmatmul.mubr.msk.f32.vlgmr.msra.gmra.mrb[0].mxu1 %vm186_vm1, %v3948_v23  ;;  %3468 = vmatpush3.bf16.msra.mxu0 %v3465_v21 }
  0x33   :  { %3480 = vmatprep.subr.bf16.mxu0 %v3791_v11  ;;  %3308 = vmatprep.mubr.msk.f32.mxu1 %vm3792_vm4, %v3788_v0 }
  0x34   :  { %3479 = vmatpush3.bf16.msra.mxu1 %v4009_v12 }
  0x35   :  { %3300 = vmatmul.mubr.msk.f32.vlgmr.msra.gmra.mrb[0].mxu0 %vm79_vm0, %v3952_v24  ;;  %3306 = vmatprep.subr.mxu1 %v3788_v0 }
  0x36   :  { %3323 = vmatprep.mubr.msk.f32.mxu0 %vm3792_vm4, %v3788_v0 }
  0x38   :  { %3307 = vmatpush3.msk.msra.mxu1 %vm273_vm6, %v4022_v13 }
  0x39   :  { %3309 = vmatmul.mubr.msk.f32.vlgmr.msra.gmra.mrb[2].mxu1 %vm269_vm7, %v3167_v14  ;;  %3490 = vmatprep.subr.bf16.mxu1 %v3905_v8 }
  0x3a   :  { %3492 = vmatpush1.bf16.msra.mxu1 %v3907_v9  ;;  %704 = vmatprep.mubr.f32.mxu1 %v3788_v0 }
  0x3b   :  { %3494 = vmatprep.subr.bf16.mxu1 %v3928_v17 }
  0x3e   :  { %3496 = vmatpush1.bf16.msra.mxu1 %v3937_v20 }
  0x3f   :  { %3497 = vmatprep.subr.bf16.mxu1 %v3791_v11 }
 0x105   :  { %v3961_v31 = vpop.f32.mrb[0].mxu1 }
 0x106   :  { %v355_v32 = vrot.slane %v3961_v31, %v3959_v30  ;;  %v258_v34 = vpop.f32.mrb[1].mxu1 }
 0x108   :  { %v356_v35 = vcombine.high %v355_v32, %v355_v32  ;;  %v363_v36 = vrot.slane %v355_v32, %v3959_v30  ;;  %v3969_v37 = vpop.f32.mrb[0].mxu0 }
 0x109   :  { %v3971_v38 = vpop.f32.mrb[1].mxu0 }
 0x10a   :  { %v370_v39 = vrot.slane %v356_v35, %v3959_v30  ;;  %v374_v40 = vrot.slane %v363_v36, %v3966_v33 }
 0x10c   :  { %v378_v41 = vrot.slane %v370_v39, %v3966_v33  ;;  %v381_v42 = vadd.f32 %v374_v40, %v3971_v38 }
 0x10e   :  { %v382_v43 = vadd.f32 %v3969_v37, %v378_v41  ;;  %3610 = vtanh.f32 %v381_v42  ;;  %v174_v41 = vld [vmem:[#allocation5 + $0x8] sm:$0xff] }
 0x110   :  { %3612 = vtanh.f32 %v382_v43  ;;  %v175_v43 = vld [vmem:[#allocation5 + $0x10] sm:$0xff] }
 0x118   :  { %v3611_v45 = vpop.eup %3610 }
 0x119   :  { %v391_v46 = vmul.f32 %v3611_v45, %v3981_v44  ;;  %v176_v45 = vld [vmem:[#allocation5 + $0x18] sm:$0xff] }
 0x11a   :  { %v3613_v47 = vpop.eup %3612 }
 0x11b   :  { %v393_v48 = vsel %vm186_vm1, %v391_v46, 0.0  ;;  %v392_v49 = vmul.f32 %v3613_v47, %v3981_v44  ;;  %v4056_v46 = vpack.c.bf16 %v176_v45, %v175_v43  ;;  %v343_v47 = vpop.f32.mrb[2].mxu1 }
 0x11c   :  { %394 = vadd.xlane.f32.xlu0 %v393_v48  ;;  %v3310_v48 = vpop.f32.mrb[3].mxu1  ;;  %v347_v7 = vmax.f32 %v343_v47, 0.0 }
 0x11d   :  { %v396_v50 = vsel %vm186_vm1, %v392_v49, 0.0  ;;  %v178_v49 = vld [vmem:[#allocation5 + $0x28] sm:$0xff] }
 0x120   :  { %397 = vadd.xlane.f32.xlu0 %v396_v50 }
 0x1a9   :  { %v395_v52 = vpop.xlane.xlu0 %394 }
 0x1aa   :  { %v404_v55 = vrot.slane %v395_v52, %v3991_v53 }
 0x1ad   :  { %v398_v54 = vpop.xlane.xlu0 %397 }
 0x1ae   :  { %v408_v56 = vrot.slane %v398_v54, %v3991_v53 }
 0x1b0   :  { %v410_v57 = vsel %vm409_vm2, %v408_v56, %v404_v55 }
 0x1b1   :  { %v413_v58 = vsel %vm412_vm3, %v410_v57, -inf }
 0x1b2   :  { %414 = vmax.xlane.f32.xlu1 %v413_v58 }
 0x23f   :  { %v415_v61 = vpop.xlane.xlu1 %414 }
 0x240   :  { %v420_v62 = vrot.slane %v415_v61, %v3966_v33  ;;  %v424_v63 = vrot.slane %v415_v61, %v3998_v60 }
 0x242   :  { %v427_v1 = vsub.f32 %v395_v52, %v420_v62  ;;  %v428_v2 = vsub.f32 %v398_v54, %v424_v63 }
 0x244   :  { %v429_v3 = vmul.f32 1.442695, %v427_v1  ;;  %v431_v4 = vmul.f32 1.442695, %v428_v2 }
 0x246   :  { %3614 = vpow2.f32 %v429_v3 }
 0x247   :  { %3616 = vpow2.f32 %v431_v4 }
 0x250   :  { %v3615_v5 = vpop.eup %3614 }
 0x251   :  { %v3617_v6 = vpop.eup %3616  ;;  %436 = vperm.xlu1 %3608, %v3615_v5  }
 0x252   :  { %439 = vperm.xlu0 %3609, %v3617_v6  }
 0x2d0   :  { %v437_v15 = vpop.permute.xlu1 %436 }
 0x2d1   :  { %v440_v16 = vpop.permute.xlu0 %439  ;;  %v444_v18 = vrot.slane %v437_v15, %v3991_v53 }
 0x2d2   :  { %v448_v19 = vrot.slane %v440_v16, %v3991_v53 }
 0x2d4   :  { %v449_v21 = vsel %vm409_vm2, %v448_v19, %v444_v18  ;;  %v4087_v18 = vld [vmem:[%s4655_s7] ss:$0 sm:$0xff] }
 0x2d5   :  { %v451_v25 = vsel %vm412_vm3, %v449_v21, 0.0 }
 0x2d6   :  { %452 = vadd.xlane.f32.xlu1 %v451_v25 }
 0x2e7   :  { %265 = vrot.lane.b32.xlu1 %v3169_v26, %s3793_s27 }
 0x2eb   :  { %630 = vrot.lane.b32.xlu1 %v3948_v23, %s3793_s27  ;;  %v173_v23 = vld [vmem:[#allocation5] sm:$0xff] }
 0x2ec   :  { %v4051_v42 = vpack.c.bf16 %v174_v41, %v173_v23 }
 0x2ee   :  { %3482 = vmatpush3.bf16.msra.mxu0 %v4051_v42 }
 0x2ef   :  { %3483 = vmatprep.subr.bf16.mxu0 %v3791_v11 }
 0x2f2   :  { %3485 = vmatpush3.bf16.msra.mxu0 %v4056_v46 }
 0x2f3   :  { %3486 = vmatprep.subr.bf16.mxu0 %v3791_v11 }
 0x363   :  { %v453_v27 = vpop.xlane.xlu1 %452 }
 0x364   :  { %3618 = vrcp.f32 %v453_v27 }
 0x367   :  { %v4046_v39 = vpop.permute.xlu1 %265 }
 0x368   :  { %v268_v40 = vadd.f32 %v4046_v39, %v3961_v31  ;;  %v177_v31 = vld [vmem:[#allocation5 + $0x20] sm:$0xff] }
 0x369   :  { %v4060_v50 = vpack.c.bf16 %v178_v49, %v177_v31 }
 0x36b   :  { %3488 = vmatpush3.bf16.msra.mxu0 %v4060_v50  ;;  %v631_v45 = vpop.permute.xlu1 %630 }
 0x36c   :  { %3500 = vmatprep.subr.bf16.mxu0 %v3791_v11 }
 0x36e   :  { %v3619_v29 = vpop.eup %3618 }
 0x36f   :  { %v459_v32 = vrot.slane %v3619_v29, %v3966_v33  ;;  %v463_v35 = vrot.slane %v3619_v29, %v3998_v60 }
 0x371   :  { %v466_v34 = vmul.f32 %v3615_v5, %v459_v32  ;;  %v467_v36 = vmul.f32 %v3617_v6, %v463_v35 }
 0x373   :  { %472 = vperm.xlu0 %3609, %v466_v34  }
 0x377   :  { %475 = vperm.xlu0 %3609, %v467_v36  }
 0x37b   :  { %604 = vrot.lane.b32.xlu0 %v268_v40, %s3794_s8 }
 0x37f   :  { %614 = vrot.lane.b32.xlu0 %v268_v40, %s3793_s27 }
 0x3f2   :  { %v4064_v52 = vpop.permute.xlu0 %472 }
 0x3f3   :  { %v503_v54 = vmul.f32 %v4064_v52, %v3939_v22 }
 0x3f5   :  { %v505_v55 = vsel %vm79_vm0, %v503_v54, 0.0 }
 0x3f6   :  { %v506_v56 = vrot.slane %v505_v55, 4  ;;  %v4069_v57 = vpop.permute.xlu0 %475 }
 0x3f7   :  { %v504_v58 = vmul.f32 %v4069_v57, %v3952_v24 }
 0x3f8   :  { %v507_v59 = vadd.f32 %v506_v56, %v505_v55  ;;  %v4107_v56 = vld [vmem:[%s4657_s9] ss:$0 sm:$0xff] }
 0x3f9   :  { %v512_v61 = vsel %vm79_vm0, %v504_v58, 0.0 }
 0x3fa   :  { %v508_v62 = vrot.slane %v507_v59, 2  ;;  %v513_v63 = vrot.slane %v512_v61, 4  ;;  %v605_v26 = vpop.permute.xlu0 %604 }
 0x3fc   :  { %v509_v1 = vadd.f32 %v508_v62, %v507_v59  ;;  %v514_v2 = vadd.f32 %v513_v63, %v512_v61 }
 0x3fe   :  { %v515_v3 = vrot.slane %v514_v2, 2  ;;  %v510_v5 = vrot.slane %v509_v1, 1  ;;  %v615_v36 = vpop.permute.xlu0 %614 }
 0x400   :  { %v516_v4 = vadd.f32 %v515_v3, %v514_v2  ;;  %v511_v10 = vadd.f32 %v510_v5, %v509_v1 }
 0x402   :  { %v517_v6 = vrot.slane %v516_v4, 1 }
 0x404   :  { %v518_v14 = vadd.f32 %v517_v6, %v516_v4 }
 0x406   :  { %v521_v15 = vsel %vm409_vm2, %v518_v14, %v511_v10 }
 0x407   :  { %v523_v16 = vadd.f32 %v521_v15, %v347_v7 }
 0x409   :  { %3324 = vmatmul.mubr.msk.f32.vlgmr.msra.gmra.mrb[2].mxu0 %vm79_vm0, %v523_v16 }
 0x40a   :  { %3502 = vmatpush3.bf16.msra.mxu0 %v4051_v42  ;;  %3347 = vmatprep.mubr.msk.f32.mxu0 %vm3792_vm4, %v3788_v0 }
 0x40b   :  { %3503 = vmatprep.subr.bf16.mxu0 %v3791_v11 }
 0x40e   :  { %3505 = vmatpush3.bf16.msra.mxu0 %v4056_v46 }
 0x40f   :  { %3506 = vmatprep.subr.bf16.mxu0 %v3791_v11 }
 0x412   :  { %3508 = vmatpush3.bf16.msra.mxu0 %v4060_v50 }
 0x413   :  { %3517 = vmatprep.subr.bf16.mxu0 %v3791_v11 }
 0x4dc   :  { %v599_v19 = vpop.f32.mrb[2].mxu0 }
 0x4dd   :  { %v600_v21 = vadd.f32 %v4087_v18, %v599_v19  ;;  %v3325_v25 = vpop.f32.mrb[3].mxu0 }
 0x4df   :  { %v607_v27 = vadd.f32 %v605_v26, %v600_v21 }
 0x4e1   :  { %v3175_v29 = vmul.f32 -1.442695, %v607_v27 }
 0x4e3   :  { %3620 = vpow2.f32 %v3175_v29 }
 0x4ed   :  { %v3621_v32 = vpop.eup %3620 }
 0x4ee   :  { %v611_v34 = vadd.f32 1.0, %v3621_v32 }
 0x4f0   :  { %3622 = vrcp.f32 %v611_v34 }
 0x4fa   :  { %v3623_v35 = vpop.eup %3622 }
 0x4fb   :  { %v617_v40 = vmul.f32 %v3623_v35, %v615_v36  ;;  %v624_v47 = vsub.f32 1.0, %v3623_v35  ;;  %v633_v31 = vmul.f32 %v3623_v35, %v631_v45 }
 0x4fd   :  { %619 = vrot.lane.b32.xlu0 %v617_v40, %s3795_s28 }
 0x56f   :  { %v620_v23 = vpop.permute.xlu0 %619 }
 0x570   :  { %v622_v41 = vadd.f32 %v620_v23, %v600_v21 }
 0x572   :  { %3624 = vtanh.f32 %v622_v41 }
 0x57c   :  { %v3625_v43 = vpop.eup %3624 }
 0x57d   :  { %626 = vrot.lane.b32.xlu0 %v3625_v43, %s3794_s8 }
 0x5ef   :  { %v627_v48 = vpop.permute.xlu0 %626 }
 0x5f0   :  { %v629_v49 = vmul.f32 %v627_v48, %v624_v47 }
 0x5f2   :  { %v4092_v54 = vadd.f32 %v633_v31, %v629_v49 }
 0x5f4   :  { %636 = vrot.lane.b32.xlu0 %v4092_v54, %s3794_s8 }
 0x666   :  { %v637_v55 = vpop.permute.xlu0 %636 }
 0x667   :  { %3176 = vmatmul.mubr.msk.f32.vlgmr.msra.gmra.mrb[4].mxu1 %vm186_vm1, %v637_v55 }
 0x668   :  { %3499 = vmatpush3.bf16.msra.mxu1 %v4009_v12  ;;  %3332 = vmatprep.mubr.msk.f32.mxu1 %vm3792_vm4, %v3788_v0 }
 0x669   :  { %3330 = vmatprep.subr.mxu1 %v3788_v0 }
 0x66c   :  { %3331 = vmatpush3.msk.msra.mxu1 %vm273_vm6, %v4022_v13 }
 0x66d   :  { %3510 = vmatprep.subr.bf16.mxu1 %v3905_v8 }
 0x73a   :  { %v4109_v58 = vpop.f32.mrb[4].mxu1 }
 0x73b   :  { %v859_v59 = vrot.slane %v4109_v58, %v3959_v30  ;;  %v708_v61 = vpop.f32.mrb[5].mxu1 }
 0x73c   :  { %v4114_v62 = vadd.f32 %v4107_v56, %v708_v61 }
 0x73d   :  { %v860_v63 = vcombine.high %v859_v59, %v859_v59  ;;  %v867_v1 = vrot.slane %v859_v59, %v3959_v30 }
 0x73e   :  { %v755_v2 = vsel %vm754_vm8, %v4114_v62, -inf }
 0x73f   :  { %v874_v3 = vrot.slane %v860_v63, %v3959_v30  ;;  %v878_v4 = vrot.slane %v867_v1, %v3966_v33  ;;  %756 = vmax.xlane.f32.xlu1 %v755_v2 }
 0x741   :  { %v882_v5 = vrot.slane %v874_v3, %v3966_v33  ;;  %v885_v6 = vadd.f32 %v878_v4, %v3971_v38 }
 0x743   :  { %v886_v7 = vadd.f32 %v3969_v37, %v882_v5  ;;  %3626 = vtanh.f32 %v885_v6 }
 0x745   :  { %3628 = vtanh.f32 %v886_v7 }
 0x74d   :  { %v3627_v10 = vpop.eup %3626 }
 0x74e   :  { %v889_v14 = vmul.f32 %v3627_v10, %v3981_v44 }
 0x74f   :  { %v3629_v15 = vpop.eup %3628 }
 0x750   :  { %v891_v16 = vsel %vm186_vm1, %v889_v14, 0.0  ;;  %v890_v19 = vmul.f32 %v3629_v15, %v3981_v44 }
 0x751   :  { %892 = vadd.xlane.f32.xlu0 %v891_v16 }
 0x752   :  { %v894_v21 = vsel %vm186_vm1, %v890_v19, 0.0 }
 0x755   :  { %895 = vadd.xlane.f32.xlu0 %v894_v21 }
 0x7cc   :  { %v757_v25 = vpop.xlane.xlu1 %756 }
 0x7cd   :  { %vm758_vm9 = vcmp.ge.f32.partialorder %v4114_v62, %v757_v25 }
 0x7ce   :  { %v759_v26 = vsel %vm758_vm9, %v3987_v51, 20  ;;  %vm1440_vm9 = vcmp.eq.s32.totalorder %v3956_v28, 2 }
 0x7cf   :  { %v760_v27 = vsel %vm754_vm8, %v759_v26, 2147483647 }
 0x7d0   :  { %v762_v29 = vshra.s32 %v760_v27, 16  ;;  %v761_v43 = vand.u32 65535, %v760_v27 }
 0x7d2   :  { %v764_v32 = vcvt.s32.f32 %v762_v29  ;;  %v763_v47 = vcvt.s32.f32 %v761_v43 }
 0x7d4   :  { %765 = vmin.xlane.f32.xlu1 %v764_v32 }
 0x7de   :  { %v893_v34 = vpop.xlane.xlu0 %892 }
 0x7df   :  { %v902_v36 = vrot.slane %v893_v34, %v3991_v53 }
 0x7e2   :  { %v896_v35 = vpop.xlane.xlu0 %895 }
 0x7e3   :  { %v906_v40 = vrot.slane %v896_v35, %v3991_v53 }
 0x7e5   :  { %v907_v23 = vsel %vm409_vm2, %v906_v40, %v902_v36  ;;  %v711_v40 = vadd.f32 %v4109_v58, %v4046_v39 }
 0x7e6   :  { %v909_v41 = vsel %vm412_vm3, %v907_v23, -inf }
 0x7e7   :  { %910 = vmax.xlane.f32.xlu0 %v909_v41 }
 0x861   :  { %v766_v45 = vpop.xlane.xlu1 %765 }
 0x862   :  { %vm767_vm10 = vcmp.eq.f32.partialorder %v764_v32, %v766_v45  ;;  %v772_v4 = vcvt.f32.s32 %v766_v45 }
 0x863   :  { %v768_v48 = vsel %vm767_vm10, %v763_v47, inf }
 0x864   :  { %769 = vmin.xlane.f32.xlu1 %v768_v48  ;;  %v773_v6 = vshll.u32 %v772_v4, 16 }
 0x874   :  { %v911_v31 = vpop.xlane.xlu0 %910 }
 0x875   :  { %v916_v49 = vrot.slane %v911_v31, %v3966_v33  ;;  %v920_v55 = vrot.slane %v911_v31, %v3998_v60 }
 0x877   :  { %v923_v59 = vsub.f32 %v893_v34, %v916_v49  ;;  %v924_v61 = vsub.f32 %v896_v35, %v920_v55 }
 0x879   :  { %v925_v63 = vmul.f32 1.442695, %v923_v59  ;;  %v927_v1 = vmul.f32 1.442695, %v924_v61 }
 0x87b   :  { %3630 = vpow2.f32 %v925_v63 }
 0x87c   :  { %3632 = vpow2.f32 %v927_v1 }
 0x885   :  { %v3631_v2 = vpop.eup %3630 }
 0x886   :  { %v3633_v3 = vpop.eup %3632  ;;  %932 = vperm.xlu0 %3609, %v3631_v2  }
 0x887   :  { %935 = vperm.xlu1 %3608, %v3633_v3  }
 0x8f1   :  { %v770_v5 = vpop.xlane.xlu1 %769 }
 0x8f2   :  { %v771_v7 = vcvt.f32.s32 %v770_v5 }
 0x8f4   :  { %v774_v10 = vadd.s32 %v773_v6, %v771_v7 }
 0x8f6   :  { %vm775_vm11 = vcmp.eq.s32.totalorder %v3987_v51, %v774_v10 }
 0x8f7   :  { %v3178_v14 = vsel %vm775_vm11, 1.0, %v3788_v0 }
 0x8f8   :  { %3333 = vmatmul.mubr.msk.f32.vlgmr.msra.gmra.mrb[6].mxu1 %vm269_vm7, %v3178_v14 }
 0x8f9   :  { %3512 = vmatpush1.bf16.msra.mxu1 %v3907_v9  ;;  %1187 = vmatprep.mubr.f32.mxu1 %v3788_v0 }
 0x8fa   :  { %3514 = vmatprep.subr.bf16.mxu1 %v3928_v17 }
 0x8fd   :  { %3516 = vmatpush1.bf16.msra.mxu1 %v3937_v20 }
 0x8fe   :  { %3520 = vmatprep.subr.bf16.mxu1 %v3791_v11 }
 0x905   :  { %v933_v15 = vpop.permute.xlu0 %932 }
 0x906   :  { %v940_v16 = vrot.slane %v933_v15, %v3991_v53  ;;  %v936_v19 = vpop.permute.xlu1 %935 }
 0x907   :  { %v944_v21 = vrot.slane %v936_v19, %v3991_v53 }
 0x909   :  { %v945_v25 = vsel %vm409_vm2, %v944_v21, %v940_v16 }
 0x90a   :  { %v947_v26 = vsel %vm412_vm3, %v945_v25, 0.0 }
 0x90b   :  { %948 = vadd.xlane.f32.xlu1 %v947_v26 }
 0x998   :  { %v949_v27 = vpop.xlane.xlu1 %948 }
 0x999   :  { %3634 = vrcp.f32 %v949_v27 }
 0x9a3   :  { %v3635_v29 = vpop.eup %3634 }
 0x9a4   :  { %v955_v32 = vrot.slane %v3635_v29, %v3966_v33  ;;  %v959_v35 = vrot.slane %v3635_v29, %v3998_v60 }
 0x9a6   :  { %v962_v34 = vmul.f32 %v3631_v2, %v955_v32  ;;  %v963_v36 = vmul.f32 %v3633_v3, %v959_v35 }
 0x9a8   :  { %968 = vperm.xlu0 %3609, %v962_v34  }
 0x9ac   :  { %971 = vperm.xlu0 %3609, %v963_v36  }
 0x9b0   :  { %1090 = vrot.lane.b32.xlu0 %v711_v40, %s3794_s8 }
 0x9b4   :  { %1100 = vrot.lane.b32.xlu0 %v711_v40, %s3793_s27 }
 0x9cb   :  { %v847_v23 = vpop.f32.mrb[6].mxu1 }
 0x9cc   :  { %v3334_v41 = vpop.f32.mrb[7].mxu1  ;;  %v851_v10 = vmax.f32 %v847_v23, 0.0 }
 0xa27   :  { %v4155_v43 = vpop.permute.xlu0 %968 }
 0xa28   :  { %v995_v45 = vmul.f32 %v4155_v43, %v3939_v22 }
 0xa2a   :  { %v997_v47 = vsel %vm79_vm0, %v995_v45, 0.0 }
 0xa2b   :  { %v998_v48 = vrot.slane %v997_v47, 4  ;;  %v4160_v31 = vpop.permute.xlu0 %971 }
 0xa2c   :  { %v996_v49 = vmul.f32 %v4160_v31, %v3952_v24 }
 0xa2d   :  { %v999_v58 = vadd.f32 %v998_v48, %v997_v47 }
 0xa2e   :  { %v1004_v55 = vsel %vm79_vm0, %v996_v49, 0.0 }
 0xa2f   :  { %v1000_v59 = vrot.slane %v999_v58, 2  ;;  %v1005_v61 = vrot.slane %v1004_v55, 4  ;;  %v1091_v25 = vpop.permute.xlu0 %1090 }
 0xa31   :  { %v1001_v63 = vadd.f32 %v1000_v59, %v999_v58  ;;  %v1006_v1 = vadd.f32 %v1005_v61, %v1004_v55 }
 0xa33   :  { %v1007_v2 = vrot.slane %v1006_v1, 2  ;;  %v1002_v3 = vrot.slane %v1001_v63, 1  ;;  %v1101_v35 = vpop.permute.xlu0 %1100 }
 0xa35   :  { %v1008_v4 = vadd.f32 %v1007_v2, %v1006_v1  ;;  %v1003_v6 = vadd.f32 %v1002_v3, %v1001_v63 }
 0xa37   :  { %v1009_v5 = vrot.slane %v1008_v4, 1 }
 0xa39   :  { %v1010_v7 = vadd.f32 %v1009_v5, %v1008_v4 }
 0xa3b   :  { %v1013_v14 = vsel %vm409_vm2, %v1010_v7, %v1003_v6 }
 0xa3c   :  { %v1015_v15 = vadd.f32 %v1013_v14, %v851_v10 }
 0xa3e   :  { %3348 = vmatmul.mubr.msk.f32.vlgmr.msra.gmra.mrb[4].mxu0 %vm79_vm0, %v1015_v15 }
 0xa3f   :  { %3519 = vmatpush3.bf16.msra.mxu0 %v4009_v12  ;;  %3356 = vmatprep.mubr.msk.f32.mxu0 %vm3792_vm4, %v3788_v0 }
 0xa40   :  { %3354 = vmatprep.subr.mxu0 %v3788_v0 }
 0xa43   :  { %3355 = vmatpush3.msk.msra.mxu0 %vm273_vm6, %v4022_v13 }
 0xa44   :  { %3530 = vmatprep.subr.bf16.mxu0 %v3905_v8 }
 0xb11   :  { %v1085_v16 = vpop.f32.mrb[4].mxu0 }
 0xb12   :  { %v1086_v19 = vadd.f32 %v4087_v18, %v1085_v16  ;;  %v3349_v21 = vpop.f32.mrb[5].mxu0 }
 0xb14   :  { %v1093_v26 = vadd.f32 %v1091_v25, %v1086_v19 }
 0xb16   :  { %v3182_v27 = vmul.f32 -1.442695, %v1093_v26 }
 0xb18   :  { %3636 = vpow2.f32 %v3182_v27 }
 0xb22   :  { %v3637_v29 = vpop.eup %3636 }
 0xb23   :  { %v1097_v32 = vadd.f32 1.0, %v3637_v29 }
 0xb25   :  { %3638 = vrcp.f32 %v1097_v32 }
 0xb2f   :  { %v3639_v34 = vpop.eup %3638 }
 0xb30   :  { %v1103_v36 = vmul.f32 %v3639_v34, %v1101_v35  ;;  %v1110_v45 = vsub.f32 1.0, %v3639_v34  ;;  %v1116_v48 = vmul.f32 %v3639_v34, %v4092_v54 }
 0xb32   :  { %1105 = vrot.lane.b32.xlu0 %v1103_v36, %s3795_s28 }
 0xba4   :  { %v1106_v40 = vpop.permute.xlu0 %1105 }
 0xba5   :  { %v1108_v23 = vadd.f32 %v1106_v40, %v1086_v19 }
 0xba7   :  { %3640 = vtanh.f32 %v1108_v23 }
 0xbb1   :  { %v3641_v41 = vpop.eup %3640 }
 0xbb2   :  { %1112 = vrot.lane.b32.xlu0 %v3641_v41, %s3794_s8 }
 0xc24   :  { %v1113_v47 = vpop.permute.xlu0 %1112 }
 0xc25   :  { %v1115_v49 = vmul.f32 %v1113_v47, %v1110_v45 }
 0xc27   :  { %v4178_v58 = vadd.f32 %v1116_v48, %v1115_v49 }
 0xc29   :  { %1119 = vrot.lane.b32.xlu0 %v4178_v58, %s3794_s8 }
 0xc9b   :  { %v1120_v55 = vpop.permute.xlu0 %1119 }
 0xc9c   :  { %3183 = vmatmul.mubr.msk.f32.vlgmr.msra.gmra.mrb[8].mxu1 %vm186_vm1, %v1120_v55 }
 0xc9d   :  { %3522 = vmatpush3.bf16.msra.mxu1 %v4051_v42  ;;  %3371 = vmatprep.mubr.msk.f32.mxu1 %vm3792_vm4, %v3788_v0 }
 0xc9e   :  { %3523 = vmatprep.subr.bf16.mxu1 %v3791_v11 }
 0xca1   :  { %3525 = vmatpush3.bf16.msra.mxu1 %v4056_v46 }
 0xca2   :  { %3526 = vmatprep.subr.bf16.mxu1 %v3791_v11 }
 0xca5   :  { %3528 = vmatpush3.bf16.msra.mxu1 %v4060_v50 }
 0xca6   :  { %3537 = vmatprep.subr.bf16.mxu1 %v3791_v11 }
 0xd6f   :  { %v4191_v54 = vpop.f32.mrb[8].mxu1 }
 0xd70   :  { %v1335_v59 = vrot.slane %v4191_v54, %v3959_v30  ;;  %v1191_v61 = vpop.f32.mrb[9].mxu1 }
 0xd71   :  { %v4196_v63 = vadd.f32 %v4107_v56, %v1191_v61 }
 0xd72   :  { %v1336_v1 = vcombine.high %v1335_v59, %v1335_v59  ;;  %v1343_v2 = vrot.slane %v1335_v59, %v3959_v30 }
 0xd73   :  { %v1231_v3 = vsel %vm754_vm8, %v4196_v63, -inf }
 0xd74   :  { %v1350_v4 = vrot.slane %v1336_v1, %v3959_v30  ;;  %v1354_v5 = vrot.slane %v1343_v2, %v3966_v33  ;;  %1232 = vmax.xlane.f32.xlu0 %v1231_v3 }
 0xd76   :  { %v1358_v6 = vrot.slane %v1350_v4, %v3966_v33  ;;  %v1361_v7 = vadd.f32 %v1354_v5, %v3971_v38 }
 0xd78   :  { %v1362_v10 = vadd.f32 %v3969_v37, %v1358_v6  ;;  %3642 = vtanh.f32 %v1361_v7 }
 0xd7a   :  { %3644 = vtanh.f32 %v1362_v10 }
 0xd82   :  { %v3643_v14 = vpop.eup %3642 }
 0xd83   :  { %v1365_v15 = vmul.f32 %v3643_v14, %v3981_v44 }
 0xd84   :  { %v3645_v16 = vpop.eup %3644 }
 0xd85   :  { %v1367_v19 = vsel %vm186_vm1, %v1365_v15, 0.0  ;;  %v1366_v21 = vmul.f32 %v3645_v16, %v3981_v44 }
 0xd86   :  { %1368 = vadd.xlane.f32.xlu1 %v1367_v19 }
 0xd87   :  { %v1370_v25 = vsel %vm186_vm1, %v1366_v21, 0.0 }
 0xd8a   :  { %1371 = vadd.xlane.f32.xlu1 %v1370_v25 }
 0xe01   :  { %v1233_v26 = vpop.xlane.xlu0 %1232 }
 0xe02   :  { %vm1234_vm12 = vcmp.ge.f32.partialorder %v4196_v63, %v1233_v26 }
 0xe03   :  { %v1235_v27 = vsel %vm1234_vm12, %v3987_v51, 20 }
 0xe04   :  { %v1236_v29 = vsel %vm754_vm8, %v1235_v27, 2147483647 }
 0xe05   :  { %v1238_v32 = vshra.s32 %v1236_v29, 16  ;;  %v1237_v47 = vand.u32 65535, %v1236_v29 }
 0xe07   :  { %v1240_v34 = vcvt.s32.f32 %v1238_v32  ;;  %v1239_v49 = vcvt.s32.f32 %v1237_v47  ;;  %v1194_v47 = vadd.f32 %v4191_v54, %v4046_v39 }
 0xe09   :  { %1241 = vmin.xlane.f32.xlu1 %v1240_v34 }
 0xe13   :  { %v1369_v35 = vpop.xlane.xlu1 %1368 }
 0xe14   :  { %v1378_v40 = vrot.slane %v1369_v35, %v3991_v53 }
 0xe17   :  { %v1372_v36 = vpop.xlane.xlu1 %1371 }
 0xe18   :  { %v1382_v23 = vrot.slane %v1372_v36, %v3991_v53 }
 0xe1a   :  { %v1383_v41 = vsel %vm409_vm2, %v1382_v23, %v1378_v40 }
 0xe1b   :  { %v1385_v45 = vsel %vm412_vm3, %v1383_v41, -inf }
 0xe1c   :  { %1386 = vmax.xlane.f32.xlu1 %v1385_v45 }
 0xe96   :  { %v1242_v48 = vpop.xlane.xlu1 %1241 }
 0xe97   :  { %vm1243_vm13 = vcmp.eq.f32.partialorder %v1240_v34, %v1242_v48  ;;  %v1248_v10 = vcvt.f32.s32 %v1242_v48 }
 0xe98   :  { %v1244_v55 = vsel %vm1243_vm13, %v1239_v49, inf  ;;  %vm1916_vm13 = vcmp.eq.s32.totalorder %v3956_v28, 3 }
 0xe99   :  { %1245 = vmin.xlane.f32.xlu1 %v1244_v55  ;;  %v1249_v15 = vshll.u32 %v1248_v10, 16  ;;  %v480_v55 = vrot.slane %v4064_v52, %v3991_v53 }
 0xe9b   :  { %v499_v54 = vsel %vm468_vm15, %v480_v55, 0.0 }
 0xea9   :  { %v1387_v59 = vpop.xlane.xlu1 %1386 }
 0xeaa   :  { %v1392_v61 = vrot.slane %v1387_v59, %v3966_v33  ;;  %v1396_v1 = vrot.slane %v1387_v59, %v3998_v60  ;;  %v976_v59 = vrot.slane %v4155_v43, %v3991_v53  ;;  %v980_v43 = vrot.slane %v4160_v31, %v3991_v53 }
 0xeac   :  { %v1399_v2 = vsub.f32 %v1369_v35, %v1392_v61  ;;  %v1400_v3 = vsub.f32 %v1372_v36, %v1396_v1  ;;  %v484_v1 = vrot.slane %v4069_v57, %v3991_v53 }
 0xeae   :  { %v1401_v4 = vmul.f32 1.442695, %v1399_v2  ;;  %v1403_v5 = vmul.f32 1.442695, %v1400_v3  ;;  %v991_v3 = vsel %vm964_vm5, %v976_v59, %v499_v54  ;;  %v500_v57 = vsel %vm468_vm15, %v484_v1, 0.0 }
 0xeb0   :  { %3646 = vpow2.f32 %v1401_v4 }
 0xeb1   :  { %3648 = vpow2.f32 %v1403_v5 }
 0xeba   :  { %v3647_v6 = vpop.eup %3646 }
 0xebb   :  { %v3649_v7 = vpop.eup %3648  ;;  %1408 = vperm.xlu1 %3608, %v3647_v6  }
 0xebc   :  { %1411 = vperm.xlu0 %3609, %v3649_v7  }
 0xf26   :  { %v1246_v14 = vpop.xlane.xlu1 %1245 }
 0xf27   :  { %v1247_v16 = vcvt.f32.s32 %v1246_v14  ;;  %v992_v14 = vsel %vm964_vm5, %v980_v43, %v500_v57 }
 0xf29   :  { %v1250_v19 = vadd.s32 %v1249_v15, %v1247_v16 }
 0xf2b   :  { %vm1251_vm14 = vcmp.eq.s32.totalorder %v3987_v51, %v1250_v19 }
 0xf2c   :  { %v3184_v21 = vsel %vm1251_vm14, 1.0, %v3788_v0 }
 0xf2d   :  { %3357 = vmatmul.mubr.msk.f32.vlgmr.msra.gmra.mrb[6].mxu0 %vm269_vm7, %v3184_v21 }
 0xf2e   :  { %3532 = vmatpush1.bf16.msra.mxu0 %v3907_v9  ;;  %1663 = vmatprep.mubr.f32.mxu0 %v3788_v0 }
 0xf2f   :  { %3534 = vmatprep.subr.bf16.mxu0 %v3928_v17 }
 0xf32   :  { %3536 = vmatpush1.bf16.msra.mxu0 %v3937_v20 }
 0xf33   :  { %3540 = vmatprep.subr.bf16.mxu0 %v3791_v11 }
 0xf3a   :  { %v1409_v25 = vpop.permute.xlu1 %1408 }
 0xf3b   :  { %v1412_v26 = vpop.permute.xlu0 %1411  ;;  %v1416_v27 = vrot.slane %v1409_v25, %v3991_v53 }
 0xf3c   :  { %v1420_v29 = vrot.slane %v1412_v26, %v3991_v53 }
 0xf3e   :  { %v1421_v32 = vsel %vm409_vm2, %v1420_v29, %v1416_v27 }
 0xf3f   :  { %v1423_v34 = vsel %vm412_vm3, %v1421_v32, 0.0 }
 0xf40   :  { %1424 = vadd.xlane.f32.xlu1 %v1423_v34 }
 0xfcd   :  { %v1425_v35 = vpop.xlane.xlu1 %1424 }
 0xfce   :  { %3650 = vrcp.f32 %v1425_v35 }
 0xfd8   :  { %v3651_v36 = vpop.eup %3650 }
 0xfd9   :  { %v1431_v40 = vrot.slane %v3651_v36, %v3966_v33  ;;  %v1435_v41 = vrot.slane %v3651_v36, %v3998_v60 }
 0xfdb   :  { %v1438_v23 = vmul.f32 %v3647_v6, %v1431_v40  ;;  %v1439_v45 = vmul.f32 %v3649_v7, %v1435_v41 }
 0xfdd   :  { %1444 = vperm.xlu0 %3609, %v1438_v23  }
 0xfe1   :  { %1447 = vperm.xlu0 %3609, %v1439_v45  }
 0xfe5   :  { %1566 = vrot.lane.b32.xlu0 %v1194_v47, %s3794_s8 }
 0xfe9   :  { %1576 = vrot.lane.b32.xlu0 %v1194_v47, %s3793_s27 }
0x1000   :  { %v1323_v48 = vpop.f32.mrb[6].mxu0 }
0x1001   :  { %v3358_v49 = vpop.f32.mrb[7].mxu0  ;;  %v1327_v36 = vmax.f32 %v1323_v48, 0.0 }
0x105c   :  { %v1445_v61 = vpop.permute.xlu0 %1444 }
0x105d   :  { %v1452_v2 = vrot.slane %v1445_v61, %v3991_v53  ;;  %v1471_v52 = vmul.f32 %v1445_v61, %v3939_v22 }
0x105f   :  { %v4256_v4 = vsel %vm1440_vm9, %v1452_v2, %v991_v3  ;;  %v1473_v5 = vsel %vm79_vm0, %v1471_v52, 0.0 }
0x1060   :  { %v1474_v6 = vrot.slane %v1473_v5, 4  ;;  %v1448_v7 = vpop.permute.xlu0 %1447 }
0x1061   :  { %v1456_v10 = vrot.slane %v1448_v7, %v3991_v53  ;;  %v1472_v22 = vmul.f32 %v1448_v7, %v3952_v24 }
0x1062   :  { %v1475_v15 = vadd.f32 %v1474_v6, %v1473_v5 }
0x1063   :  { %v4267_v31 = vsel %vm1440_vm9, %v1456_v10, %v992_v14  ;;  %v1480_v16 = vsel %vm79_vm0, %v1472_v22, 0.0 }
0x1064   :  { %v1476_v19 = vrot.slane %v1475_v15, 2  ;;  %v1481_v21 = vrot.slane %v1480_v16, 4  ;;  %v1567_v48 = vpop.permute.xlu0 %1566 }
0x1066   :  { %v1477_v25 = vadd.f32 %v1476_v19, %v1475_v15  ;;  %v1482_v26 = vadd.f32 %v1481_v21, %v1480_v16 }
0x1068   :  { %v1483_v27 = vrot.slane %v1482_v26, 2  ;;  %v1478_v29 = vrot.slane %v1477_v25, 1  ;;  %v1577_v1 = vpop.permute.xlu0 %1576 }
0x106a   :  { %v1484_v32 = vadd.f32 %v1483_v27, %v1482_v26  ;;  %v1479_v35 = vadd.f32 %v1478_v29, %v1477_v25 }
0x106c   :  { %v1485_v34 = vrot.slane %v1484_v32, 1 }
0x106e   :  { %v1486_v24 = vadd.f32 %v1485_v34, %v1484_v32 }
0x1070   :  { %v1489_v40 = vsel %vm409_vm2, %v1486_v24, %v1479_v35 }
0x1071   :  { %v1491_v23 = vadd.f32 %v1489_v40, %v1327_v36 }
0x1073   :  { %3372 = vmatmul.mubr.msk.f32.vlgmr.msra.gmra.mrb[10].mxu1 %vm79_vm0, %v1491_v23 }
0x1074   :  { %3539 = vmatpush3.bf16.msra.mxu1 %v4009_v12  ;;  %3380 = vmatprep.mubr.msk.f32.mxu1 %vm3792_vm4, %v3788_v0 }
0x1075   :  { %3378 = vmatprep.subr.mxu1 %v3788_v0 }
0x1078   :  { %3379 = vmatpush3.msk.msra.mxu1 %vm273_vm6, %v4022_v13 }
0x1079   :  { %3550 = vmatprep.subr.bf16.mxu1 %v3905_v8 }
0x1146   :  { %v1561_v41 = vpop.f32.mrb[10].mxu1 }
0x1147   :  { %v1562_v45 = vadd.f32 %v4087_v18, %v1561_v41  ;;  %v3373_v47 = vpop.f32.mrb[11].mxu1 }
0x1149   :  { %v1569_v49 = vadd.f32 %v1567_v48, %v1562_v45 }
0x114b   :  { %v3188_v55 = vmul.f32 -1.442695, %v1569_v49 }
0x114d   :  { %3652 = vpow2.f32 %v3188_v55 }
0x1157   :  { %v3653_v59 = vpop.eup %3652 }
0x1158   :  { %v1573_v61 = vadd.f32 1.0, %v3653_v59 }
0x115a   :  { %3654 = vrcp.f32 %v1573_v61 }
0x1164   :  { %v3655_v54 = vpop.eup %3654 }
0x1165   :  { %v1579_v2 = vmul.f32 %v3655_v54, %v1577_v1  ;;  %v1586_v43 = vsub.f32 1.0, %v3655_v54  ;;  %v1592_v6 = vmul.f32 %v3655_v54, %v4178_v58 }
0x1167   :  { %1581 = vrot.lane.b32.xlu0 %v1579_v2, %s3795_s28 }
0x11d9   :  { %v1582_v52 = vpop.permute.xlu0 %1581 }
0x11da   :  { %v1584_v13 = vadd.f32 %v1582_v52, %v1562_v45 }
0x11dc   :  { %3656 = vtanh.f32 %v1584_v13 }
0x11e6   :  { %v3657_v3 = vpop.eup %3656 }
0x11e7   :  { %1588 = vrot.lane.b32.xlu0 %v3657_v3, %s3794_s8 }
0x1259   :  { %v1589_v5 = vpop.permute.xlu0 %1588 }
0x125a   :  { %v1591_v7 = vmul.f32 %v1589_v5, %v1586_v43 }
0x125c   :  { %v4283_v57 = vadd.f32 %v1592_v6, %v1591_v7 }
0x125e   :  { %1595 = vrot.lane.b32.xlu0 %v4283_v57, %s3794_s8 }
0x12d0   :  { %v1596_v10 = vpop.permute.xlu0 %1595 }
0x12d1   :  { %3189 = vmatmul.mubr.msk.f32.vlgmr.msra.gmra.mrb[8].mxu0 %vm186_vm1, %v1596_v10 }
0x12d2   :  { %3542 = vmatpush3.bf16.msra.mxu0 %v4051_v42  ;;  %3395 = vmatprep.mubr.msk.f32.mxu0 %vm3792_vm4, %v3788_v0 }
0x12d3   :  { %3543 = vmatprep.subr.bf16.mxu0 %v3791_v11 }
0x12d6   :  { %3545 = vmatpush3.bf16.msra.mxu0 %v4056_v46 }
0x12d7   :  { %3546 = vmatprep.subr.bf16.mxu0 %v3791_v11 }
0x12da   :  { %3548 = vmatpush3.bf16.msra.mxu0 %v4060_v50 }
0x12db   :  { %3557 = vmatprep.subr.bf16.mxu0 %v3791_v11 }
0x13a4   :  { %v4296_v58 = vpop.f32.mrb[8].mxu0 }
0x13a5   :  { %v1811_v22 = vrot.slane %v4296_v58, %v3959_v30  ;;  %v1667_v14 = vpop.f32.mrb[9].mxu0 }
0x13a6   :  { %v4301_v15 = vadd.f32 %v4107_v56, %v1667_v14 }
0x13a7   :  { %v1812_v16 = vcombine.high %v1811_v22, %v1811_v22  ;;  %v1819_v19 = vrot.slane %v1811_v22, %v3959_v30 }
0x13a8   :  { %v1707_v21 = vsel %vm754_vm8, %v4301_v15, -inf }
0x13a9   :  { %v1826_v25 = vrot.slane %v1812_v16, %v3959_v30  ;;  %v1830_v26 = vrot.slane %v1819_v19, %v3966_v33  ;;  %1708 = vmax.xlane.f32.xlu1 %v1707_v21 }
0x13ab   :  { %v1834_v27 = vrot.slane %v1826_v25, %v3966_v33  ;;  %v1837_v29 = vadd.f32 %v1830_v26, %v3971_v38 }
0x13ad   :  { %v1838_v32 = vadd.f32 %v3969_v37, %v1834_v27  ;;  %3658 = vtanh.f32 %v1837_v29 }
0x13af   :  { %3660 = vtanh.f32 %v1838_v32 }
0x13b7   :  { %v3659_v34 = vpop.eup %3658 }
0x13b8   :  { %v1841_v35 = vmul.f32 %v3659_v34, %v3981_v44 }
0x13b9   :  { %v3661_v24 = vpop.eup %3660 }
0x13ba   :  { %v1843_v36 = vsel %vm186_vm1, %v1841_v35, 0.0  ;;  %v1842_v40 = vmul.f32 %v3661_v24, %v3981_v44 }
0x13bb   :  { %1844 = vadd.xlane.f32.xlu0 %v1843_v36 }
0x13bc   :  { %v1846_v23 = vsel %vm186_vm1, %v1842_v40, 0.0 }
0x13bd   :  { %1847 = vadd.xlane.f32.xlu1 %v1846_v23 }
0x1436   :  { %v1709_v41 = vpop.xlane.xlu1 %1708 }
0x1437   :  { %vm1710_vm10 = vcmp.ge.f32.partialorder %v4301_v15, %v1709_v41 }
0x1438   :  { %v1711_v45 = vsel %vm1710_vm10, %v3987_v51, 20 }
0x1439   :  { %v1712_v47 = vsel %vm754_vm8, %v1711_v45, 2147483647 }
0x143a   :  { %v1714_v48 = vshra.s32 %v1712_v47, 16  ;;  %v1713_v2 = vand.u32 65535, %v1712_v47 }
0x143c   :  { %v1716_v49 = vcvt.s32.f32 %v1714_v48  ;;  %v1715_v13 = vcvt.s32.f32 %v1713_v2  ;;  %v4344_v2 = vld [vmem:[#allocation2] sm:$0xff] }
0x143e   :  { %1717 = vmin.xlane.f32.xlu1 %v1716_v49 }
0x1448   :  { %v1845_v55 = vpop.xlane.xlu0 %1844 }
0x1449   :  { %v1854_v61 = vrot.slane %v1845_v55, %v3991_v53 }
0x144a   :  { %v1848_v59 = vpop.xlane.xlu1 %1847 }
0x144b   :  { %v1858_v44 = vrot.slane %v1848_v59, %v3991_v53 }
0x144d   :  { %v1859_v54 = vsel %vm409_vm2, %v1858_v44, %v1854_v61 }
0x144e   :  { %v1861_v1 = vsel %vm412_vm3, %v1859_v54, -inf }
0x144f   :  { %1862 = vmax.xlane.f32.xlu1 %v1861_v1 }
0x14cb   :  { %v1718_v52 = vpop.xlane.xlu1 %1717 }
0x14cc   :  { %vm1719_vm11 = vcmp.eq.f32.partialorder %v1716_v49, %v1718_v52  ;;  %v1724_v21 = vcvt.f32.s32 %v1718_v52 }
0x14cd   :  { %v1720_v3 = vsel %vm1719_vm11, %v1715_v13, inf }
0x14ce   :  { %1721 = vmin.xlane.f32.xlu1 %v1720_v3  ;;  %v1725_v26 = vshll.u32 %v1724_v21, 16 }
0x14dc   :  { %v1863_v43 = vpop.xlane.xlu1 %1862 }
0x14dd   :  { %v1868_v5 = vrot.slane %v1863_v43, %v3966_v33  ;;  %v1872_v6 = vrot.slane %v1863_v43, %v3998_v60 }
0x14df   :  { %v1875_v7 = vsub.f32 %v1845_v55, %v1868_v5  ;;  %v1876_v10 = vsub.f32 %v1848_v59, %v1872_v6  ;;  %v1670_v59 = vadd.f32 %v4296_v58, %v4046_v39  ;;  %v4354_v6 = vld [vmem:[#allocation2 + $0x8] sm:$0xff] }
0x14e1   :  { %v1877_v22 = vmul.f32 1.442695, %v1875_v7  ;;  %v1879_v14 = vmul.f32 1.442695, %v1876_v10 }
0x14e3   :  { %3662 = vpow2.f32 %v1877_v22 }
0x14e4   :  { %3664 = vpow2.f32 %v1879_v14 }
0x14ed   :  { %v3663_v16 = vpop.eup %3662 }
0x14ee   :  { %v3665_v19 = vpop.eup %3664  ;;  %1884 = vperm.xlu1 %3608, %v3663_v16  }
0x14ef   :  { %1887 = vperm.xlu0 %3609, %v3665_v19  }
0x155b   :  { %v1722_v25 = vpop.xlane.xlu1 %1721 }
0x155c   :  { %v1723_v27 = vcvt.f32.s32 %v1722_v25 }
0x155e   :  { %v1726_v29 = vadd.s32 %v1725_v26, %v1723_v27 }
0x1560   :  { %vm1727_vm12 = vcmp.eq.s32.totalorder %v3987_v51, %v1726_v29 }
0x1561   :  { %v3190_v32 = vsel %vm1727_vm12, 1.0, %v3788_v0  ;;  %vm2392_vm12 = vcmp.eq.s32.totalorder %v3956_v28, 4 }
0x1562   :  { %3381 = vmatmul.mubr.msk.f32.vlgmr.msra.gmra.mrb[12].mxu1 %vm269_vm7, %v3190_v32 }
0x1563   :  { %3552 = vmatpush1.bf16.msra.mxu1 %v3907_v9  ;;  %2139 = vmatprep.mubr.f32.mxu1 %v3788_v0 }
0x1564   :  { %3554 = vmatprep.subr.bf16.mxu1 %v3928_v17 }
0x1567   :  { %3556 = vmatpush1.bf16.msra.mxu1 %v3937_v20 }
0x1568   :  { %3560 = vmatprep.subr.bf16.mxu1 %v3791_v11 }
0x156d   :  { %v1885_v34 = vpop.permute.xlu1 %1884 }
0x156e   :  { %v1888_v35 = vpop.permute.xlu0 %1887  ;;  %v1892_v24 = vrot.slane %v1885_v34, %v3991_v53 }
0x156f   :  { %v1896_v36 = vrot.slane %v1888_v35, %v3991_v53 }
0x1571   :  { %v1897_v40 = vsel %vm409_vm2, %v1896_v36, %v1892_v24 }
0x1572   :  { %v1899_v23 = vsel %vm412_vm3, %v1897_v40, 0.0 }
0x1573   :  { %1900 = vadd.xlane.f32.xlu1 %v1899_v23 }
0x1600   :  { %v1901_v41 = vpop.xlane.xlu1 %1900 }
0x1601   :  { %3666 = vrcp.f32 %v1901_v41 }
0x160b   :  { %v3667_v45 = vpop.eup %3666 }
0x160c   :  { %v1907_v47 = vrot.slane %v3667_v45, %v3966_v33  ;;  %v1911_v49 = vrot.slane %v3667_v45, %v3998_v60 }
0x160e   :  { %v1914_v48 = vmul.f32 %v3663_v16, %v1907_v47  ;;  %v1915_v55 = vmul.f32 %v3665_v19, %v1911_v49 }
0x1610   :  { %1920 = vperm.xlu0 %3609, %v1914_v48  }
0x1614   :  { %1923 = vperm.xlu0 %3609, %v1915_v55  }
0x1618   :  { %2042 = vrot.lane.b32.xlu0 %v1670_v59, %s3794_s8 }
0x161c   :  { %2052 = vrot.lane.b32.xlu0 %v1670_v59, %s3793_s27 }
0x1635   :  { %v1799_v61 = vpop.f32.mrb[12].mxu1 }
0x1636   :  { %v3382_v44 = vpop.f32.mrb[13].mxu1  ;;  %v1803_v35 = vmax.f32 %v1799_v61, 0.0 }
0x168f   :  { %v1921_v54 = vpop.permute.xlu0 %1920 }
0x1690   :  { %v1928_v1 = vrot.slane %v1921_v54, %v3991_v53  ;;  %v1947_v52 = vmul.f32 %v4344_v2, %v1921_v54 }
0x1692   :  { %v4350_v13 = vsel %vm1916_vm13, %v1928_v1, %v4256_v4  ;;  %v1949_v58 = vsel %vm79_vm0, %v1947_v52, 0.0 }
0x1693   :  { %v1950_v3 = vrot.slane %v1949_v58, 4  ;;  %v1924_v43 = vpop.permute.xlu0 %1923 }
0x1694   :  { %v1932_v5 = vrot.slane %v1924_v43, %v3991_v53  ;;  %v1948_v7 = vmul.f32 %v4354_v6, %v1924_v43 }
0x1695   :  { %v1951_v10 = vadd.f32 %v1950_v3, %v1949_v58 }
0x1696   :  { %v4360_v22 = vsel %vm1916_vm13, %v1932_v5, %v4267_v31  ;;  %v1956_v14 = vsel %vm79_vm0, %v1948_v7, 0.0  ;;  %v4372_v31 = vld [vmem:[%s4650_s2 + $0x10] sm:$0xf] }
0x1697   :  { %v1952_v4 = vrot.slane %v1951_v10, 2  ;;  %v1957_v16 = vrot.slane %v1956_v14, 4  ;;  %v2043_v45 = vpop.permute.xlu0 %2042 }
0x1699   :  { %v1953_v19 = vadd.f32 %v1952_v4, %v1951_v10  ;;  %v1958_v21 = vadd.f32 %v1957_v16, %v1956_v14 }
0x169b   :  { %v1959_v25 = vrot.slane %v1958_v21, 2  ;;  %v1954_v26 = vrot.slane %v1953_v19, 1  ;;  %v2053_v61 = vpop.permute.xlu0 %2052 }
0x169d   :  { %v1960_v27 = vadd.f32 %v1959_v25, %v1958_v21  ;;  %v1955_v32 = vadd.f32 %v1954_v26, %v1953_v19 }
0x169f   :  { %v1961_v29 = vrot.slane %v1960_v27, 1 }
0x16a1   :  { %v1962_v34 = vadd.f32 %v1961_v29, %v1960_v27 }
0x16a3   :  { %v1965_v24 = vsel %vm409_vm2, %v1962_v34, %v1955_v32  ;;  %v4412_v34 = vld [vmem:[%s4652_s4] ss:$0 sm:$0xff] }
0x16a4   :  { %v1967_v36 = vadd.f32 %v1965_v24, %v1803_v35 }
0x16a6   :  { %3396 = vmatmul.mubr.msk.f32.vlgmr.msra.gmra.mrb[10].mxu0 %vm79_vm0, %v1967_v36 }
0x16a7   :  { %3559 = vmatpush3.bf16.msra.mxu0 %v4009_v12  ;;  %3404 = vmatprep.mubr.msk.f32.mxu0 %vm3792_vm4, %v3788_v0 }
0x16a8   :  { %3402 = vmatprep.subr.mxu0 %v3788_v0 }
0x16ab   :  { %3403 = vmatpush3.msk.msra.mxu0 %vm273_vm6, %v4372_v31 }
0x16ac   :  { %3570 = vmatprep.subr.bf16.mxu0 %v3905_v8 }
0x1779   :  { %v2037_v40 = vpop.f32.mrb[10].mxu0 }
0x177a   :  { %v2038_v23 = vadd.f32 %v4087_v18, %v2037_v40  ;;  %v3397_v41 = vpop.f32.mrb[11].mxu0 }
0x177c   :  { %v2045_v47 = vadd.f32 %v2043_v45, %v2038_v23 }
0x177e   :  { %v3194_v48 = vmul.f32 -1.442695, %v2045_v47 }
0x1780   :  { %3668 = vpow2.f32 %v3194_v48 }
0x178a   :  { %v3669_v49 = vpop.eup %3668 }
0x178b   :  { %v2049_v55 = vadd.f32 1.0, %v3669_v49 }
0x178d   :  { %3670 = vrcp.f32 %v2049_v55 }
0x1797   :  { %v3671_v59 = vpop.eup %3670 }
0x1798   :  { %v2055_v44 = vmul.f32 %v3671_v59, %v2053_v61  ;;  %v2062_v18 = vsub.f32 1.0, %v3671_v59  ;;  %v2068_v3 = vmul.f32 %v3671_v59, %v4283_v57 }
0x179a   :  { %2057 = vrot.lane.b32.xlu0 %v2055_v44, %s3795_s28 }
0x180c   :  { %v2058_v54 = vpop.permute.xlu0 %2057 }
0x180d   :  { %v2060_v1 = vadd.f32 %v2058_v54, %v2038_v23 }
0x180f   :  { %3672 = vtanh.f32 %v2060_v1 }
0x1819   :  { %v3673_v52 = vpop.eup %3672 }
0x181a   :  { %2064 = vrot.lane.b32.xlu1 %v3673_v52, %s3794_s8 }
0x188c   :  { %v2065_v58 = vpop.permute.xlu1 %2064 }
0x188d   :  { %v2067_v43 = vmul.f32 %v2065_v58, %v2062_v18 }
0x188f   :  { %v4381_v5 = vadd.f32 %v2068_v3, %v2067_v43 }
0x1891   :  { %2071 = vrot.lane.b32.xlu0 %v4381_v5, %s3794_s8 }
0x1903   :  { %v2072_v7 = vpop.permute.xlu0 %2071 }
0x1904   :  { %3195 = vmatmul.mubr.msk.f32.vlgmr.msra.gmra.mrb[14].mxu1 %vm186_vm1, %v2072_v7 }
0x1905   :  { %3562 = vmatpush3.bf16.msra.mxu1 %v4051_v42  ;;  %3419 = vmatprep.mubr.msk.f32.mxu1 %vm3792_vm4, %v3788_v0 }
0x1906   :  { %3563 = vmatprep.subr.bf16.mxu1 %v3791_v11 }
0x1909   :  { %3565 = vmatpush3.bf16.msra.mxu1 %v4056_v46 }
0x190a   :  { %3566 = vmatprep.subr.bf16.mxu1 %v3791_v11 }
0x190d   :  { %3568 = vmatpush3.bf16.msra.mxu1 %v4060_v50 }
0x190e   :  { %3577 = vmatprep.subr.bf16.mxu1 %v3791_v11 }
0x19d7   :  { %v4394_v57 = vpop.f32.mrb[14].mxu1 }
0x19d8   :  { %v2287_v10 = vrot.slane %v4394_v57, %v3959_v30  ;;  %v2143_v14 = vpop.f32.mrb[15].mxu1 }
0x19d9   :  { %v4399_v4 = vadd.f32 %v4107_v56, %v2143_v14 }
0x19da   :  { %v2288_v16 = vcombine.high %v2287_v10, %v2287_v10  ;;  %v2295_v19 = vrot.slane %v2287_v10, %v3959_v30 }
0x19db   :  { %v2183_v21 = vsel %vm754_vm8, %v4399_v4, -inf }
0x19dc   :  { %v2302_v25 = vrot.slane %v2288_v16, %v3959_v30  ;;  %v2306_v26 = vrot.slane %v2295_v19, %v3966_v33  ;;  %2184 = vmax.xlane.f32.xlu0 %v2183_v21 }
0x19de   :  { %v2310_v27 = vrot.slane %v2302_v25, %v3966_v33  ;;  %v2313_v29 = vadd.f32 %v2306_v26, %v3971_v38 }
0x19e0   :  { %v2314_v32 = vadd.f32 %v3969_v37, %v2310_v27  ;;  %3674 = vtanh.f32 %v2313_v29 }
0x19e2   :  { %3676 = vtanh.f32 %v2314_v32 }
0x19ea   :  { %v3675_v56 = vpop.eup %3674 }
0x19eb   :  { %v2317_v35 = vmul.f32 %v4412_v34, %v3675_v56 }
0x19ec   :  { %v3677_v24 = vpop.eup %3676 }
0x19ed   :  { %v2319_v36 = vsel %vm186_vm1, %v2317_v35, 0.0  ;;  %v2318_v40 = vmul.f32 %v4412_v34, %v3677_v24 }
0x19ee   :  { %2320 = vadd.xlane.f32.xlu1 %v2319_v36 }
0x19ef   :  { %v2322_v23 = vsel %vm186_vm1, %v2318_v40, 0.0 }
0x19f0   :  { %2323 = vadd.xlane.f32.xlu0 %v2322_v23 }
0x1a69   :  { %v2185_v41 = vpop.xlane.xlu0 %2184 }
0x1a6a   :  { %vm2186_vm14 = vcmp.ge.f32.partialorder %v4399_v4, %v2185_v41 }
0x1a6b   :  { %v2187_v45 = vsel %vm2186_vm14, %v3987_v51, 20 }
0x1a6c   :  { %v2188_v47 = vsel %vm754_vm8, %v2187_v45, 2147483647 }
0x1a6d   :  { %v2190_v48 = vshra.s32 %v2188_v47, 16  ;;  %v2189_v52 = vand.u32 65535, %v2188_v47 }
0x1a6f   :  { %v2192_v49 = vcvt.s32.f32 %v2190_v48  ;;  %v2191_v58 = vcvt.s32.f32 %v2189_v52 }
0x1a71   :  { %2193 = vmin.xlane.f32.xlu0 %v2192_v49 }
0x1a7b   :  { %v2321_v55 = vpop.xlane.xlu1 %2320 }
0x1a7c   :  { %v2330_v61 = vrot.slane %v2321_v55, %v3991_v53 }
0x1a7d   :  { %v2324_v59 = vpop.xlane.xlu0 %2323 }
0x1a7e   :  { %v2334_v44 = vrot.slane %v2324_v59, %v3991_v53 }
0x1a80   :  { %v2335_v54 = vsel %vm409_vm2, %v2334_v44, %v2330_v61  ;;  %v2146_v61 = vadd.f32 %v4394_v57, %v4046_v39 }
0x1a81   :  { %v2337_v1 = vsel %vm412_vm3, %v2335_v54, -inf }
0x1a82   :  { %2338 = vmax.xlane.f32.xlu0 %v2337_v1 }
0x1afe   :  { %v2194_v18 = vpop.xlane.xlu0 %2193 }
0x1aff   :  { %vm2195_vm10 = vcmp.eq.f32.partialorder %v2192_v49, %v2194_v18  ;;  %v2200_v27 = vcvt.f32.s32 %v2194_v18 }
0x1b00   :  { %v2196_v3 = vsel %vm2195_vm10, %v2191_v58, inf }
0x1b01   :  { %2197 = vmin.xlane.f32.xlu0 %v2196_v3  ;;  %v2201_v32 = vshll.u32 %v2200_v27, 16 }
0x1b0f   :  { %v2339_v43 = vpop.xlane.xlu0 %2338 }
0x1b10   :  { %v2344_v7 = vrot.slane %v2339_v43, %v3966_v33  ;;  %v2348_v10 = vrot.slane %v2339_v43, %v3998_v60 }
0x1b12   :  { %v2351_v14 = vsub.f32 %v2321_v55, %v2344_v7  ;;  %v2352_v16 = vsub.f32 %v2324_v59, %v2348_v10 }
0x1b14   :  { %v2353_v19 = vmul.f32 1.442695, %v2351_v14  ;;  %v2355_v21 = vmul.f32 1.442695, %v2352_v16 }
0x1b16   :  { %3678 = vpow2.f32 %v2353_v19 }
0x1b17   :  { %3680 = vpow2.f32 %v2355_v21 }
0x1b20   :  { %v3679_v25 = vpop.eup %3678 }
0x1b21   :  { %v3681_v26 = vpop.eup %3680  ;;  %2360 = vperm.xlu0 %3609, %v3679_v25  }
0x1b22   :  { %2363 = vperm.xlu1 %3608, %v3681_v26  }
0x1b8e   :  { %v2198_v29 = vpop.xlane.xlu0 %2197 }
0x1b8f   :  { %v2199_v56 = vcvt.f32.s32 %v2198_v29 }
0x1b91   :  { %v2202_v35 = vadd.s32 %v2201_v32, %v2199_v56 }
0x1b93   :  { %vm2203_vm11 = vcmp.eq.s32.totalorder %v3987_v51, %v2202_v35 }
0x1b94   :  { %v3196_v24 = vsel %vm2203_vm11, 1.0, %v3788_v0 }
0x1b95   :  { %3405 = vmatmul.mubr.msk.f32.vlgmr.msra.gmra.mrb[12].mxu0 %vm269_vm7, %v3196_v24 }
0x1b96   :  { %3572 = vmatpush1.bf16.msra.mxu0 %v3907_v9  ;;  %2615 = vmatprep.mubr.f32.mxu0 %v3788_v0 }
0x1b97   :  { %3574 = vmatprep.subr.bf16.mxu0 %v3928_v17 }
0x1b9a   :  { %3576 = vmatpush1.bf16.msra.mxu0 %v3937_v20 }
0x1b9b   :  { %3580 = vmatprep.subr.bf16.mxu0 %v3791_v11 }
0x1ba0   :  { %v2361_v36 = vpop.permute.xlu0 %2360 }
0x1ba1   :  { %v2364_v40 = vpop.permute.xlu1 %2363  ;;  %v2368_v23 = vrot.slane %v2361_v36, %v3991_v53 }
0x1ba2   :  { %v2372_v41 = vrot.slane %v2364_v40, %v3991_v53 }
0x1ba4   :  { %v2373_v45 = vsel %vm409_vm2, %v2372_v41, %v2368_v23  ;;  %v4474_v41 = vld [vmem:[%s4655_s7] ss:$0 sm:$0xff] }
0x1ba5   :  { %v2375_v47 = vsel %vm412_vm3, %v2373_v45, 0.0 }
0x1ba6   :  { %2376 = vadd.xlane.f32.xlu1 %v2375_v47 }
0x1c33   :  { %v2377_v9 = vpop.xlane.xlu1 %2376 }
0x1c34   :  { %3682 = vrcp.f32 %v2377_v9 }
0x1c3e   :  { %v3683_v48 = vpop.eup %3682 }
0x1c3f   :  { %v2383_v49 = vrot.slane %v3683_v48, %v3966_v33  ;;  %v2387_v20 = vrot.slane %v3683_v48, %v3998_v60 }
0x1c41   :  { %v2390_v55 = vmul.f32 %v3679_v25, %v2383_v49  ;;  %v2391_v59 = vmul.f32 %v3681_v26, %v2387_v20 }
0x1c43   :  { %2396 = vperm.xlu0 %3609, %v2390_v55  }
0x1c47   :  { %2399 = vperm.xlu0 %3609, %v2391_v59  }
0x1c4b   :  { %2518 = vrot.lane.b32.xlu0 %v2146_v61, %s3794_s8 }
0x1c4f   :  { %2528 = vrot.lane.b32.xlu0 %v2146_v61, %s3793_s27 }
0x1c68   :  { %v2275_v44 = vpop.f32.mrb[12].mxu0 }
0x1c69   :  { %v3406_v54 = vpop.f32.mrb[13].mxu0  ;;  %v2279_v36 = vmax.f32 %v2275_v44, 0.0 }
0x1cc2   :  { %v2397_v1 = vpop.permute.xlu0 %2396 }
0x1cc3   :  { %v2404_v52 = vrot.slane %v2397_v1, %v3991_v53  ;;  %v2423_v18 = vmul.f32 %v4344_v2, %v2397_v1 }
0x1cc5   :  { %v4451_v58 = vsel %vm2392_vm12, %v2404_v52, %v4350_v13  ;;  %v2425_v57 = vsel %vm79_vm0, %v2423_v18, 0.0 }
0x1cc6   :  { %v2426_v3 = vrot.slane %v2425_v57, 4  ;;  %v2400_v43 = vpop.permute.xlu0 %2399 }
0x1cc7   :  { %v2408_v7 = vrot.slane %v2400_v43, %v3991_v53  ;;  %v2424_v10 = vmul.f32 %v4354_v6, %v2400_v43 }
0x1cc8   :  { %v2427_v14 = vadd.f32 %v2426_v3, %v2425_v57 }
0x1cc9   :  { %v4459_v16 = vsel %vm2392_vm12, %v2408_v7, %v4360_v22  ;;  %v2432_v19 = vsel %vm79_vm0, %v2424_v10, 0.0 }
0x1cca   :  { %v2428_v21 = vrot.slane %v2427_v14, 2  ;;  %v2433_v25 = vrot.slane %v2432_v19, 4 }
0x1ccc   :  { %v2429_v13 = vadd.f32 %v2428_v21, %v2427_v14  ;;  %v2434_v26 = vadd.f32 %v2433_v25, %v2432_v19 }
0x1cce   :  { %v2435_v27 = vrot.slane %v2434_v26, 2  ;;  %v2430_v29 = vrot.slane %v2429_v13, 1 }
0x1cd0   :  { %v2436_v32 = vadd.f32 %v2435_v27, %v2434_v26  ;;  %v2431_v35 = vadd.f32 %v2430_v29, %v2429_v13 }
0x1cd2   :  { %v2437_v56 = vrot.slane %v2436_v32, 1 }
0x1cd4   :  { %v2438_v24 = vadd.f32 %v2437_v56, %v2436_v32 }
0x1cd6   :  { %v2441_v40 = vsel %vm409_vm2, %v2438_v24, %v2431_v35 }
0x1cd7   :  { %v2443_v23 = vadd.f32 %v2441_v40, %v2279_v36 }
0x1cd9   :  { %3420 = vmatmul.mubr.msk.f32.vlgmr.msra.gmra.mrb[16].mxu1 %vm79_vm0, %v2443_v23 }
0x1cda   :  { %3579 = vmatpush3.bf16.msra.mxu1 %v4009_v12  ;;  %3428 = vmatprep.mubr.msk.f32.mxu1 %vm3792_vm4, %v3788_v0  ;;  %v2519_v12 = vpop.permute.xlu0 %2518 }
0x1cdb   :  { %3426 = vmatprep.subr.mxu1 %v3788_v0 }
0x1cde   :  { %3427 = vmatpush3.msk.msra.mxu1 %vm273_vm6, %v4372_v31  ;;  %v2529_v31 = vpop.permute.xlu0 %2528 }
0x1cdf   :  { %3589 = vmatprep.subr.bf16.mxu1 %v3791_v11 }
0x1dac   :  { %v2513_v22 = vpop.f32.mrb[16].mxu1 }
0x1dad   :  { %v2514_v45 = vadd.f32 %v4474_v41, %v2513_v22  ;;  %v3421_v47 = vpop.f32.mrb[17].mxu1 }
0x1daf   :  { %v2521_v9 = vadd.f32 %v2519_v12, %v2514_v45 }
0x1db1   :  { %v3200_v48 = vmul.f32 -1.442695, %v2521_v9 }
0x1db3   :  { %3684 = vpow2.f32 %v3200_v48 }
0x1dbd   :  { %v3685_v49 = vpop.eup %3684 }
0x1dbe   :  { %v2525_v55 = vadd.f32 1.0, %v3685_v49 }
0x1dc0   :  { %3686 = vrcp.f32 %v2525_v55 }
0x1dca   :  { %v3687_v20 = vpop.eup %3686 }
0x1dcb   :  { %v2531_v59 = vmul.f32 %v3687_v20, %v2529_v31  ;;  %v2538_v1 = vsub.f32 1.0, %v3687_v20  ;;  %v2544_v18 = vmul.f32 %v3687_v20, %v4381_v5 }
0x1dcd   :  { %2533 = vrot.lane.b32.xlu0 %v2531_v59, %s3795_s28 }
0x1e3f   :  { %v2534_v61 = vpop.permute.xlu0 %2533 }
0x1e40   :  { %v2536_v44 = vadd.f32 %v2534_v61, %v2514_v45 }
0x1e42   :  { %3688 = vtanh.f32 %v2536_v44 }
0x1e4c   :  { %v3689_v54 = vpop.eup %3688 }
0x1e4d   :  { %2540 = vrot.lane.b32.xlu0 %v3689_v54, %s3794_s8 }
0x1ebf   :  { %v2541_v52 = vpop.permute.xlu0 %2540 }
0x1ec0   :  { %v2543_v57 = vmul.f32 %v2541_v52, %v2538_v1 }
0x1ec2   :  { %v4480_v3 = vadd.f32 %v2544_v18, %v2543_v57 }
0x1ec4   :  { %2547 = vrot.lane.b32.xlu0 %v4480_v3, %s3794_s8 }
0x1f36   :  { %v2548_v43 = vpop.permute.xlu0 %2547 }
0x1f37   :  { %3201 = vmatmul.mubr.msk.f32.vlgmr.msra.gmra.mrb[14].mxu0 %vm186_vm1, %v2548_v43 }
0x1f38   :  { %3582 = vmatpush3.bf16.msra.mxu0 %v4051_v42  ;;  %3443 = vmatprep.mubr.msk.f32.mxu0 %vm3792_vm4, %v3788_v0  ;;  %v4499_v42 = vld [vmem:[%s4657_s9] ss:$0 sm:$0xff] }
0x1f39   :  { %3583 = vmatprep.subr.bf16.mxu0 %v3791_v11 }
0x1f3c   :  { %3585 = vmatpush3.bf16.msra.mxu0 %v4056_v46 }
0x1f3d   :  { %3586 = vmatprep.subr.bf16.mxu0 %v3791_v11 }
0x1f40   :  { %3588 = vmatpush3.bf16.msra.mxu0 %v4060_v50 }
0x200a   :  { %v4492_v5 = vpop.f32.mrb[14].mxu0 }
0x200b   :  { %v2763_v7 = vrot.slane %v4492_v5, %v3959_v30  ;;  %v2619_v10 = vpop.f32.mrb[15].mxu0 }
0x200c   :  { %v4502_v14 = vadd.f32 %v4499_v42, %v2619_v10 }
0x200d   :  { %v2764_v19 = vcombine.high %v2763_v7, %v2763_v7  ;;  %v2771_v46 = vrot.slane %v2763_v7, %v3959_v30 }
0x200e   :  { %v2659_v50 = vsel %vm754_vm8, %v4502_v14, -inf }
0x200f   :  { %v2778_v21 = vrot.slane %v2764_v19, %v3959_v30  ;;  %v2782_v25 = vrot.slane %v2771_v46, %v3966_v33  ;;  %2660 = vmax.xlane.f32.xlu0 %v2659_v50 }
0x2011   :  { %v2786_v13 = vrot.slane %v2778_v21, %v3966_v33  ;;  %v2789_v26 = vadd.f32 %v2782_v25, %v3971_v38 }
0x2013   :  { %v2790_v27 = vadd.f32 %v3969_v37, %v2786_v13  ;;  %3690 = vtanh.f32 %v2789_v26 }
0x2015   :  { %3692 = vtanh.f32 %v2790_v27 }
0x201d   :  { %v3691_v29 = vpop.eup %3690 }
0x201e   :  { %v2793_v32 = vmul.f32 %v4412_v34, %v3691_v29 }
0x201f   :  { %v3693_v56 = vpop.eup %3692 }
0x2020   :  { %v2795_v35 = vsel %vm186_vm1, %v2793_v32, 0.0  ;;  %v2794_v24 = vmul.f32 %v4412_v34, %v3693_v56 }
0x2021   :  { %2796 = vadd.xlane.f32.xlu1 %v2795_v35  ;;  %v2622_v35 = vadd.f32 %v4492_v5, %v4046_v39 }
0x2022   :  { %v2798_v36 = vsel %vm186_vm1, %v2794_v24, 0.0 }
0x2025   :  { %2799 = vadd.xlane.f32.xlu1 %v2798_v36 }
0x209c   :  { %v2661_v40 = vpop.xlane.xlu0 %2660 }
0x209d   :  { %vm2662_vm6 = vcmp.ge.f32.partialorder %v4502_v14, %v2661_v40 }
0x209e   :  { %v2663_v38 = vsel %vm2662_vm6, %v3987_v51, 20 }
0x209f   :  { %v2664_v37 = vsel %vm754_vm8, %v2663_v38, 2147483647 }
0x20a0   :  { %v2666_v23 = vshra.s32 %v2664_v37, 16  ;;  %v2665_v49 = vand.u32 65535, %v2664_v37 }
0x20a2   :  { %v2668_v22 = vcvt.s32.f32 %v2666_v23  ;;  %v2667_v20 = vcvt.s32.f32 %v2665_v49 }
0x20a4   :  { %2669 = vmin.xlane.f32.xlu1 %v2668_v22 }
0x20ae   :  { %v2797_v45 = vpop.xlane.xlu1 %2796 }
0x20af   :  { %v2806_v12 = vrot.slane %v2797_v45, %v3991_v53 }
0x20b2   :  { %v2800_v47 = vpop.xlane.xlu1 %2799 }
0x20b3   :  { %v2810_v34 = vrot.slane %v2800_v47, %v3991_v53 }
0x20b5   :  { %v2811_v9 = vsel %vm409_vm2, %v2810_v34, %v2806_v12 }
0x20b6   :  { %v2813_v48 = vsel %vm412_vm3, %v2811_v9, -inf }
0x20b7   :  { %2814 = vmax.xlane.f32.xlu1 %v2813_v48 }
0x2131   :  { %v2670_v55 = vpop.xlane.xlu1 %2669 }
0x2132   :  { %vm2671_vm14 = vcmp.eq.f32.partialorder %v2668_v22, %v2670_v55  ;;  %v2676_v7 = vcvt.f32.s32 %v2670_v55 }
0x2133   :  { %v2672_v31 = vsel %vm2671_vm14, %v2667_v20, inf }
0x2134   :  { %2673 = vmin.xlane.f32.xlu1 %v2672_v31  ;;  %v2677_v19 = vshll.u32 %v2676_v7, 16 }
0x2144   :  { %v2815_v59 = vpop.xlane.xlu1 %2814 }
0x2145   :  { %v2820_v61 = vrot.slane %v2815_v59, %v3966_v33  ;;  %v2824_v44 = vrot.slane %v2815_v59, %v3998_v60 }
0x2147   :  { %v2827_v54 = vsub.f32 %v2797_v45, %v2820_v61  ;;  %v2828_v1 = vsub.f32 %v2800_v47, %v2824_v44 }
0x2149   :  { %v2829_v52 = vmul.f32 1.442695, %v2827_v54  ;;  %v2831_v18 = vmul.f32 1.442695, %v2828_v1 }
0x214b   :  { %3694 = vpow2.f32 %v2829_v52 }
0x214c   :  { %3696 = vpow2.f32 %v2831_v18 }
0x2155   :  { %v3695_v57 = vpop.eup %3694 }
0x2156   :  { %v3697_v43 = vpop.eup %3696  ;;  %2836 = vperm.xlu1 %3608, %v3695_v57  }
0x2157   :  { %2839 = vperm.xlu0 %3609, %v3697_v43  }
0x21c1   :  { %v2674_v10 = vpop.xlane.xlu1 %2673 }
0x21c2   :  { %v2675_v46 = vcvt.f32.s32 %v2674_v10 }
0x21c4   :  { %v2678_v50 = vadd.s32 %v2677_v19, %v2675_v46 }
0x21c6   :  { %vm2679_vm8 = vcmp.eq.s32.totalorder %v3987_v51, %v2678_v50 }
0x21c7   :  { %v3202_v21 = vsel %vm2679_vm8, 1.0, %v3788_v0 }
0x21c8   :  { %3429 = vmatmul.mubr.msk.f32.vlgmr.msra.gmra.mrb[18].mxu1 %vm269_vm7, %v3202_v21 }
0x21c9   :  { %3591 = vmatpush3.bf16.msra.mxu1 %v3905_v8  ;;  %3454 = vmatprep.mubr.msk.f32.mxu1 %vm3792_vm4, %v3788_v0  ;;  %vm3135_vm4 = vcmask 62464  }
0x21ca   :  { %3592 = vmatprep.subr.bf16.mxu1 %v3791_v11 }
0x21cd   :  { %3594 = vmatpush3.bf16.msra.mxu1 %v3928_v17 }
0x21d5   :  { %v2837_v25 = vpop.permute.xlu1 %2836 }
0x21d6   :  { %v2840_v13 = vpop.permute.xlu0 %2839  ;;  %v2844_v26 = vrot.slane %v2837_v25, %v3991_v53 }
0x21d7   :  { %v2848_v27 = vrot.slane %v2840_v13, %v3991_v53 }
0x21d9   :  { %v2849_v51 = vsel %vm409_vm2, %v2848_v27, %v2844_v26 }
0x21da   :  { %v2851_v29 = vsel %vm412_vm3, %v2849_v51, 0.0  ;;  %vm2868_vm3 = vcmp.eq.s32.totalorder %v3956_v28, 5 }
0x21db   :  { %2852 = vadd.xlane.f32.xlu1 %v2851_v29 }
0x2268   :  { %v2853_v32 = vpop.xlane.xlu1 %2852 }
0x2269   :  { %3698 = vrcp.f32 %v2853_v32 }
0x2273   :  { %v3699_v8 = vpop.eup %3698 }
0x2274   :  { %v2859_v0 = vrot.slane %v3699_v8, %v3966_v33  ;;  %v2863_v11 = vrot.slane %v3699_v8, %v3998_v60 }
0x2276   :  { %v2866_v56 = vmul.f32 %v3695_v57, %v2859_v0  ;;  %v2867_v17 = vmul.f32 %v3697_v43, %v2863_v11 }
0x2278   :  { %2872 = vperm.xlu0 %3609, %v2866_v56  }
0x227c   :  { %2875 = vperm.xlu0 %3609, %v2867_v17  }
0x2280   :  { %2994 = vrot.lane.b32.xlu0 %v2622_v35, %s3794_s8 }
0x2284   :  { %3004 = vrot.lane.b32.xlu0 %v2622_v35, %s3793_s27 }
0x229b   :  { %v2751_v24 = vpop.f32.mrb[18].mxu1 }
0x229c   :  { %v3430_v36 = vpop.f32.mrb[19].mxu1  ;;  %v2755_v59 = vmax.f32 %v2751_v24, 0.0 }
0x22f7   :  { %v2873_v40 = vpop.permute.xlu0 %2872 }
0x22f8   :  { %v2880_v38 = vrot.slane %v2873_v40, %v3991_v53  ;;  %v2899_v60 = vmul.f32 %v4344_v2, %v2873_v40 }
0x22fa   :  { %v2895_v37 = vsel %vm2868_vm3, %v2880_v38, %v4451_v58  ;;  %v2901_v39 = vsel %vm79_vm0, %v2899_v60, 0.0 }
0x22fb   :  { %v2902_v5 = vrot.slane %v2901_v39, 4  ;;  %3136 = vst.msk [vmem:[%s4659_s11] sm:$0x3f] %vm3135_vm4, %v2895_v37  ;;  %v2876_v23 = vpop.permute.xlu0 %2875 }
0x22fc   :  { %v2884_v22 = vrot.slane %v2876_v23, %v3991_v53  ;;  %v2900_v45 = vmul.f32 %v4354_v6, %v2876_v23 }
0x22fd   :  { %v2903_v47 = vadd.f32 %v2902_v5, %v2901_v39 }
0x22fe   :  { %v2896_v2 = vsel %vm2868_vm3, %v2884_v22, %v4459_v16  ;;  %v2908_v12 = vsel %vm79_vm0, %v2900_v45, 0.0 }
0x22ff   :  { %v2904_v58 = vrot.slane %v2903_v47, 2  ;;  %v2909_v34 = vrot.slane %v2908_v12, 4  ;;  %3137 = vst.msk [vmem:[%s4659_s11 + $0x8] sm:$0x3f] %vm3135_vm4, %v2896_v2  ;;  %v2995_v52 = vpop.permute.xlu0 %2994  ;;  %s3796_s11 = smov [#allocation7]  }
0x2300   :  { %s3151_s3 = sshll.u32 %s3796_s11, 4  ;;  %s3152_s3 = int_to_ptr.vmem [resolvable:$true] %s3151_s3 }
0x2301   :  { %v2905_v9 = vadd.f32 %v2904_v58, %v2903_v47  ;;  %v2910_v48 = vadd.f32 %v2909_v34, %v2908_v12  ;;  %s3756_s18 = scalar_lea.vmem %s3152_s3, 32  ;;  %p3761_p3 = scmp.lt.s32.totalorder %s3152_s3, %s3152_s3 }
0x2302   :  { %p3757_p2 = scmp.ne.s32.totalorder %s3152_s3, %s3756_s18  ;;  %p3762_p4 = scmp.lt.s32.totalorder %s3756_s18, %s3756_s18 }
0x2303   :  { %v2911_v49 = vrot.slane %v2910_v48, 2  ;;  %v2906_v55 = vrot.slane %v2905_v9, 1  ;;  %v3005_v19 = vpop.permute.xlu0 %3004 }
0x2304   :  { %p3763_p5 = por %p3762_p4, %p3761_p3 }
0x2305   :  { %v2912_v53 = vadd.f32 %v2911_v49, %v2910_v48  ;;  %v2907_v6 = vadd.f32 %v2906_v55, %v2905_v9 }
0x2306   :  { %p3764_p6 = pnand %p3763_p5, %p3757_p2 }
0x2307   :  { %v2913_v20 = vrot.slane %v2912_v53, 1 }
0x2309   :  { %v2914_v31 = vadd.f32 %v2913_v20, %v2912_v53 }
0x230b   :  { %v2917_v61 = vsel %vm409_vm2, %v2914_v31, %v2907_v6 }
0x230c   :  { %v2919_v16 = vadd.f32 %v2917_v61, %v2755_v59 }
0x230e   :  { %3444 = vmatmul.mubr.msk.f32.vlgmr.msra.gmra.mrb[16].mxu0 %vm79_vm0, %v2919_v16  ;;  %vm3139_vm0 = vcmask 254976  }
0x23e1   :  { %v2989_v44 = vpop.f32.mrb[16].mxu0 }
0x23e2   :  { %v2990_v54 = vadd.f32 %v4474_v41, %v2989_v44  ;;  %v3445_v1 = vpop.f32.mrb[17].mxu0 }
0x23e4   :  { %v2997_v18 = vadd.f32 %v2995_v52, %v2990_v54 }
0x23e6   :  { %v3206_v57 = vmul.f32 -1.442695, %v2997_v18 }
0x23e8   :  { %3700 = vpow2.f32 %v3206_v57 }
0x23f2   :  { %v3701_v43 = vpop.eup %3700 }
0x23f3   :  { %v3001_v7 = vadd.f32 1.0, %v3701_v43 }
0x23f5   :  { %3702 = vrcp.f32 %v3001_v7 }
0x23ff   :  { %v3703_v10 = vpop.eup %3702 }
0x2400   :  { %v3007_v46 = vmul.f32 %v3703_v10, %v3005_v19  ;;  %v3014_v41 = vsub.f32 1.0, %v3703_v10  ;;  %v3020_v26 = vmul.f32 %v3703_v10, %v4480_v3 }
0x2402   :  { %3009 = vrot.lane.b32.xlu0 %v3007_v46, %s3795_s28 }
0x2474   :  { %v3010_v50 = vpop.permute.xlu0 %3009 }
0x2475   :  { %v3012_v21 = vadd.f32 %v3010_v50, %v2990_v54 }
0x2477   :  { %3704 = vtanh.f32 %v3012_v21 }
0x2481   :  { %v3705_v25 = vpop.eup %3704 }
0x2482   :  { %3016 = vrot.lane.b32.xlu0 %v3705_v25, %s3794_s8 }
0x24f4   :  { %v3017_v13 = vpop.permute.xlu0 %3016 }
0x24f5   :  { %v3019_v27 = vmul.f32 %v3017_v13, %v3014_v41 }
0x24f7   :  { %v3021_v51 = vadd.f32 %v3020_v26, %v3019_v27 }
0x24f9   :  { %3023 = vrot.lane.b32.xlu1 %v3021_v51, %s3794_s8 }
0x256b   :  { %v3024_v29 = vpop.permute.xlu1 %3023 }
0x256c   :  { %3455 = vmatmul.mubr.msk.f32.vlgmr.msra.gmra.mrb[20].mxu1 %vm186_vm1, %v3024_v29  ;;  %3140 = vst.msk [vmem:[#allocation7] sm:$0x3] %vm3139_vm0, %v3024_v29 }
0x256d   :  { %3767 = shalt.err (!%p3764_p6)
}
0x256e   :  { %s3768_s21 = scalar_lea.hbm %s4660_s12, 32 }
0x256f   :  { %p3769_p7 = scmp.ne.s32.totalorder %s4660_s12, %s3768_s21  ;;  %p3772_p8 = scmp.lt.u32.totalorder %s3768_s21, %s4660_s12 }
0x2571   :  { %p3774_p9 = pnand %p3772_p8, %p3769_p7 }
0x2573   :  { %3777 = shalt.err (!%p3774_p9)
}
0x2574   :  { %3154 = dma.vmem_to_hbm [thread:$0]  %s3152_s3, 32, %s4660_s12, [#allocation4]   ;;  %v726_v3 = vrot.slane %v4114_v62, %v3959_v30  ;;  %v1203_v32 = vrot.slane %v4196_v63, %v3959_v30  ;;  %v1679_v0 = vrot.slane %v4301_v15, %v3959_v30  ;;  %v2155_v56 = vrot.slane %v4399_v4, %v3959_v30 }
0x2575   :  { %v2631_v17 = vrot.slane %v4502_v14, %v3959_v30  ;;  %vm3132_vm1 = vcmask 160768  }
0x2576   :  { %v727_v8 = vcombine.high %v726_v3, %v726_v3  ;;  %v1204_v11 = vcombine.high %v1203_v32, %v1203_v32  ;;  %v734_v35 = vrot.slane %v726_v3, %v3959_v30  ;;  %v1680_v36 = vcombine.high %v1679_v0, %v1679_v0 }
0x2577   :  { %v1211_v62 = vrot.slane %v1203_v32, %v3959_v30  ;;  %v2156_v40 = vcombine.high %v2155_v56, %v2155_v56  ;;  %v1687_v38 = vrot.slane %v1679_v0, %v3959_v30  ;;  %v2632_v15 = vcombine.high %v2631_v17, %v2631_v17 }
0x2578   :  { %v741_v24 = vrot.slane %v727_v8, %v3959_v30  ;;  %v1218_v63 = vrot.slane %v1204_v11, %v3959_v30  ;;  %v2163_v60 = vrot.slane %v2155_v56, %v3959_v30  ;;  %v745_v4 = vrot.slane %v734_v35, %v3966_v33 }
0x2579   :  { %v1694_v14 = vrot.slane %v1680_v36, %v3959_v30  ;;  %v2639_v39 = vrot.slane %v2631_v17, %v3959_v30  ;;  %v1222_v23 = vrot.slane %v1211_v62, %v3966_v33  ;;  %v2170_v22 = vrot.slane %v2156_v40, %v3959_v30 }
0x257a   :  { %v749_v37 = vrot.slane %v741_v24, %v3966_v33  ;;  %v1226_v2 = vrot.slane %v1218_v63, %v3966_v33  ;;  %v1698_v12 = vrot.slane %v1687_v38, %v3966_v33  ;;  %v2646_v58 = vrot.slane %v2632_v15, %v3959_v30 }
0x257b   :  { %v2174_v34 = vrot.slane %v2163_v60, %v3966_v33  ;;  %v752_v48 = vsel %vm468_vm15, %v745_v4, 0.0  ;;  %v1702_v55 = vrot.slane %v1694_v14, %v3966_v33  ;;  %v2178_v20 = vrot.slane %v2170_v22, %v3966_v33 }
0x257c   :  { %v753_v49 = vsel %vm468_vm15, %v749_v37, 0.0  ;;  %v1229_v53 = vsel %vm964_vm5, %v1222_v23, %v752_v48  ;;  %v2654_v16 = vrot.slane %v2646_v58, %v3966_v33 }
0x257d   :  { %v1230_v59 = vsel %vm964_vm5, %v1226_v2, %v753_v49  ;;  %v1705_v61 = vsel %vm1440_vm9, %v1698_v12, %v1229_v53 }
0x257e   :  { %v2181_v44 = vsel %vm1916_vm13, %v2174_v34, %v1705_v61  ;;  %v1706_v52 = vsel %vm1440_vm9, %v1702_v55, %v1230_v59 }
0x257f   :  { %v2182_v57 = vsel %vm1916_vm13, %v2178_v20, %v1706_v52 }
0x263f   :  { %v3093_v5 = vpop.f32.mrb[20].mxu1 }
0x2640   :  { %v3094_v45 = vadd.f32 %v4499_v42, %v3093_v5  ;;  %v3456_v47 = vpop.f32.mrb[21].mxu1  ;;  %v2650_v42 = vrot.slane %v2639_v39, %v3966_v33 }
0x2642   :  { %v3104_v9 = vrot.slane %v3094_v45, %v3959_v30  ;;  %v2657_v18 = vsel %vm2392_vm12, %v2650_v42, %v2181_v44 }
0x2644   :  { %v3105_v6 = vcombine.high %v3104_v9, %v3104_v9  ;;  %v3112_v31 = vrot.slane %v3104_v9, %v3959_v30 }
0x2646   :  { %v3119_v54 = vrot.slane %v3105_v6, %v3959_v30  ;;  %v3123_v1 = vrot.slane %v3112_v31, %v3966_v33  ;;  %v2658_v30 = vsel %vm2392_vm12, %v2654_v16, %v2182_v57 }
0x2648   :  { %v3127_v43 = vrot.slane %v3119_v54, %v3966_v33  ;;  %v3130_v7 = vsel %vm2868_vm3, %v3123_v1, %v2657_v18 }
0x2649   :  { %3133 = vst.msk [vmem:[%s4658_s10] sm:$0x3f] %vm3132_vm1, %v3130_v7 }
0x264a   :  { %v3131_v10 = vsel %vm2868_vm3, %v3127_v43, %v2658_v30 }
0x264b   :  { %3134 = vst.msk [vmem:[%s4658_s10 + $0x8] sm:$0x3f] %vm3132_vm1, %v3131_v10 }
0x264c   :  { %3782 = dma.done.wait [#allocation4], 32  }
0x264d   :  { %3783 = vsyncadd [#allocation4], 4294967264 }
0x264e   :  { %3162 = vsyncpa [#allocation3], 1 }
0x264f   :  { %3163 = vsyncpa [#allocation6], 1 }
0x2650   :  { %3164 = vsyncpa [#allocation4], 1 }

</bundles_post_ra>
